<compile_context>
chip_gen: v5e
topology: v5e:2x2
jax: 0.10.0
libtpu: 0.0.40
codegen_flags: <defaults>
</compile_context>

<pallas_src>
import jax
import jax.numpy as jnp
from jax.experimental import pallas as pl
from jax.experimental.pallas import tpu as pltpu


def _dsconv_kernel(x_ref, wd_ref, bd_ref, wp_ref, bp_ref, o_ref):
    """One batch element, NHWC layout.

    x_ref : (1, H+2, W+2, Cin)  spatially pre-padded input tile
    wd_ref: (9, Cin)            depthwise 3x3 weights, taps flattened (kh*3+kw)
    bd_ref: (1, Cin)            depthwise bias
    wp_ref: (Cin, Cout)         pointwise 1x1 weights
    bp_ref: (1, Cout)           pointwise bias
    o_ref : (1, H, W, Cout)
    """
    H = o_ref.shape[1]
    W = o_ref.shape[2]
    cin = x_ref.shape[3]

    x = x_ref[0].astype(jnp.float32)                      # (H+2, W+2, Cin)

    # Depthwise 3x3: sum of 9 statically-shifted taps, each scaled by the
    # per-channel weight (broadcast over spatial dims).  Accumulate in f32.
    acc = None
    for kh in range(3):
        for kw in range(3):
            tap = x[kh:kh + H, kw:kw + W, :]              # (H, W, Cin) static slice
            k = kh * 3 + kw
            w = wd_ref[k:k + 1, :].astype(jnp.float32)    # (1, Cin), broadcasts
            term = tap * w
            acc = term if acc is None else acc + term
    acc = acc + bd_ref[0:1, :].astype(jnp.float32)        # (H, W, Cin)

    # Pointwise 1x1 conv == matmul over the channel axis (MXU, f32 accumulate).
    acc2d = acc.reshape(H * W, cin)
    out = jnp.dot(acc2d, wp_ref[...].astype(jnp.float32),
                  preferred_element_type=jnp.float32)     # (H*W, Cout)
    out = out + bp_ref[0:1, :].astype(jnp.float32)

    o_ref[0] = out.reshape(H, W, -1).astype(o_ref.dtype)


def depthwise_separable_conv(x, depth_w, depth_b, point_w, point_b):
    """Matches PyTorch depthwise_separable_conv.forward.

    x       : (B, Cin, H, W)   NCHW (PyTorch layout)
    depth_w : (Cin, 1, 3, 3),  depth_b: (Cin,)
    point_w : (Cout, Cin, 1, 1), point_b: (Cout,)
    returns : (B, Cout, H, W)
    """
    B, Cin, H, W = x.shape
    Cout = point_w.shape[0]

    # Channels-last for TPU (channels -> lanes), zero-pad the 3x3 halo once
    # in the wrapper so the kernel only does static, in-bounds slices.
    x_nhwc = jnp.transpose(x, (0, 2, 3, 1))
    x_pad = jnp.pad(x_nhwc, ((0, 0), (1, 1), (1, 1), (0, 0)))

    wd = depth_w.reshape(Cin, 9).T            # (9, Cin), row k = tap kh*3+kw
    bd = depth_b.reshape(1, Cin)
    wp = point_w.reshape(Cout, Cin).T         # (Cin, Cout)
    bp = point_b.reshape(1, Cout)

    # One full image per grid step: the whole per-step working set
    # (~(H+2)*(W+2)*Cin + H*W*Cout floats) is far below VMEM for these shapes;
    # for very large H*W one would additionally tile over rows with a halo.
    out_nhwc = pl.pallas_call(
        _dsconv_kernel,
        out_shape=jax.ShapeDtypeStruct((B, H, W, Cout), x.dtype),
        grid_spec=pltpu.PrefetchScalarGridSpec(
            num_scalar_prefetch=0,
            grid=(B,),
            in_specs=[
                pl.BlockSpec((1, H + 2, W + 2, Cin), lambda b: (b, 0, 0, 0)),
                pl.BlockSpec((9, Cin), lambda b: (0, 0)),
                pl.BlockSpec((1, Cin), lambda b: (0, 0)),
                pl.BlockSpec((Cin, Cout), lambda b: (0, 0)),
                pl.BlockSpec((1, Cout), lambda b: (0, 0)),
            ],
            out_specs=pl.BlockSpec((1, H, W, Cout), lambda b: (b, 0, 0, 0)),
        ),
        compiler_params=pltpu.CompilerParams(
            dimension_semantics=("parallel",),   # batch axis shards across TCs (v7x)
        ),
    )(x_pad, wd, bd, wp, bp)

    return jnp.transpose(out_nhwc, (0, 3, 1, 2))


def _reference(x, depth_w, depth_b, point_w, point_b):
    """Pure-JAX reference (lax convolutions), NCHW like PyTorch."""
    cin = x.shape[1]
    y = jax.lax.conv_general_dilated(
        x, depth_w, window_strides=(1, 1), padding=((1, 1), (1, 1)),
        dimension_numbers=("NCHW", "OIHW", "NCHW"),
        feature_group_count=cin)
    y = y + depth_b.reshape(1, -1, 1, 1)
    z = jax.lax.conv_general_dilated(
        y, point_w, window_strides=(1, 1), padding="VALID",
        dimension_numbers=("NCHW", "OIHW", "NCHW"))
    z = z + point_b.reshape(1, -1, 1, 1)
    return z


if __name__ == "__main__":
    key = jax.random.PRNGKey(0)
    B, Cin, Cout, H, W = 2, 4, 8, 16, 16
    kx, kdw, kdb, kpw, kpb = jax.random.split(key, 5)

    x = jax.random.normal(kx, (B, Cin, H, W), dtype=jnp.float32)
    depth_w = jax.random.normal(kdw, (Cin, 1, 3, 3), dtype=jnp.float32) * 0.2
    depth_b = jax.random.normal(kdb, (Cin,), dtype=jnp.float32) * 0.1
    point_w = jax.random.normal(kpw, (Cout, Cin, 1, 1), dtype=jnp.float32) * 0.2
    point_b = jax.random.normal(kpb, (Cout,), dtype=jnp.float32) * 0.1

    out = depthwise_separable_conv(x, depth_w, depth_b, point_w, point_b)
    out = jax.block_until_ready(out)

    ref = _reference(x, depth_w, depth_b, point_w, point_b)
    assert out.shape == (B, Cout, H, W)
    assert jnp.allclose(out, ref, atol=1e-4, rtol=1e-4)

    print("KERNEL_OK")
</pallas_src>

<mosaic_0001>
module attributes {stable_mosaic.version = 11 : i64} {
  func.func @_dsconv_kernel(%arg0: i32, %arg1: memref<1x18x18x4xf32, #tpu.memory_space<vmem>>, %arg2: memref<9x4xf32, #tpu.memory_space<vmem>>, %arg3: memref<1x4xf32, #tpu.memory_space<vmem>>, %arg4: memref<4x8xf32, #tpu.memory_space<vmem>>, %arg5: memref<1x8xf32, #tpu.memory_space<vmem>>, %arg6: memref<1x16x16x8xf32, #tpu.memory_space<vmem>>) attributes {dimension_semantics = [#tpu.dimension_semantics<parallel>], iteration_bounds = array<i64: 2>, scalar_prefetch = 0 : i64, scratch_operands = 0 : i64, tpu.core_type = #tpu.core_type<tc>, window_params = [{transform_indices = @transform_0, window_bounds = array<i64: 1, 18, 18, 4>}, {pipeline_mode = #tpu.pipeline_mode<synchronous>, transform_indices = @transform_1, window_bounds = array<i64: 9, 4>}, {pipeline_mode = #tpu.pipeline_mode<synchronous>, transform_indices = @transform_2, window_bounds = array<i64: 1, 4>}, {pipeline_mode = #tpu.pipeline_mode<synchronous>, transform_indices = @transform_3, window_bounds = array<i64: 4, 8>}, {pipeline_mode = #tpu.pipeline_mode<synchronous>, transform_indices = @transform_4, window_bounds = array<i64: 1, 8>}, {transform_indices = @transform_5, window_bounds = array<i64: 1, 16, 16, 8>}]} {
    %c0 = arith.constant 0 : index
    %c0_0 = arith.constant 0 : index
    %c0_1 = arith.constant 0 : index
    %c0_2 = arith.constant 0 : index
    %0 = vector.load %arg1[%c0, %c0_0, %c0_1, %c0_2] : memref<1x18x18x4xf32, #tpu.memory_space<vmem>>, vector<1x18x18x4xf32>
    %1 = vector.shape_cast %0 : vector<1x18x18x4xf32> to vector<18x18x4xf32>
    %2 = vector.extract_strided_slice %1 {offsets = [0, 0, 0], sizes = [16, 16, 4], strides = [1, 1, 1]} : vector<18x18x4xf32> to vector<16x16x4xf32>
    %c0_3 = arith.constant 0 : index
    %c0_4 = arith.constant 0 : index
    %3 = vector.load %arg2[%c0_3, %c0_4] : memref<9x4xf32, #tpu.memory_space<vmem>>, vector<1x4xf32>
    %4 = vector.shape_cast %3 : vector<1x4xf32> to vector<1x1x4xf32>
    %5 = vector.broadcast %4 : vector<1x1x4xf32> to vector<16x16x4xf32>
    %6 = arith.mulf %2, %5 : vector<16x16x4xf32>
    %7 = vector.extract_strided_slice %1 {offsets = [0, 1, 0], sizes = [16, 16, 4], strides = [1, 1, 1]} : vector<18x18x4xf32> to vector<16x16x4xf32>
    %c1 = arith.constant 1 : index
    %c0_5 = arith.constant 0 : index
    %8 = vector.load %arg2[%c1, %c0_5] : memref<9x4xf32, #tpu.memory_space<vmem>>, vector<1x4xf32>
    %9 = vector.shape_cast %8 : vector<1x4xf32> to vector<1x1x4xf32>
    %10 = vector.broadcast %9 : vector<1x1x4xf32> to vector<16x16x4xf32>
    %11 = arith.mulf %7, %10 : vector<16x16x4xf32>
    %12 = arith.addf %6, %11 : vector<16x16x4xf32>
    %13 = vector.extract_strided_slice %1 {offsets = [0, 2, 0], sizes = [16, 16, 4], strides = [1, 1, 1]} : vector<18x18x4xf32> to vector<16x16x4xf32>
    %c2 = arith.constant 2 : index
    %c0_6 = arith.constant 0 : index
    %14 = vector.load %arg2[%c2, %c0_6] : memref<9x4xf32, #tpu.memory_space<vmem>>, vector<1x4xf32>
    %15 = vector.shape_cast %14 : vector<1x4xf32> to vector<1x1x4xf32>
    %16 = vector.broadcast %15 : vector<1x1x4xf32> to vector<16x16x4xf32>
    %17 = arith.mulf %13, %16 : vector<16x16x4xf32>
    %18 = arith.addf %12, %17 : vector<16x16x4xf32>
    %19 = vector.extract_strided_slice %1 {offsets = [1, 0, 0], sizes = [16, 16, 4], strides = [1, 1, 1]} : vector<18x18x4xf32> to vector<16x16x4xf32>
    %c3 = arith.constant 3 : index
    %c0_7 = arith.constant 0 : index
    %20 = vector.load %arg2[%c3, %c0_7] : memref<9x4xf32, #tpu.memory_space<vmem>>, vector<1x4xf32>
    %21 = vector.shape_cast %20 : vector<1x4xf32> to vector<1x1x4xf32>
    %22 = vector.broadcast %21 : vector<1x1x4xf32> to vector<16x16x4xf32>
    %23 = arith.mulf %19, %22 : vector<16x16x4xf32>
    %24 = arith.addf %18, %23 : vector<16x16x4xf32>
    %25 = vector.extract_strided_slice %1 {offsets = [1, 1, 0], sizes = [16, 16, 4], strides = [1, 1, 1]} : vector<18x18x4xf32> to vector<16x16x4xf32>
    %c4 = arith.constant 4 : index
    %c0_8 = arith.constant 0 : index
    %26 = vector.load %arg2[%c4, %c0_8] : memref<9x4xf32, #tpu.memory_space<vmem>>, vector<1x4xf32>
    %27 = vector.shape_cast %26 : vector<1x4xf32> to vector<1x1x4xf32>
    %28 = vector.broadcast %27 : vector<1x1x4xf32> to vector<16x16x4xf32>
    %29 = arith.mulf %25, %28 : vector<16x16x4xf32>
    %30 = arith.addf %24, %29 : vector<16x16x4xf32>
    %31 = vector.extract_strided_slice %1 {offsets = [1, 2, 0], sizes = [16, 16, 4], strides = [1, 1, 1]} : vector<18x18x4xf32> to vector<16x16x4xf32>
    %c5 = arith.constant 5 : index
    %c0_9 = arith.constant 0 : index
    %32 = vector.load %arg2[%c5, %c0_9] : memref<9x4xf32, #tpu.memory_space<vmem>>, vector<1x4xf32>
    %33 = vector.shape_cast %32 : vector<1x4xf32> to vector<1x1x4xf32>
    %34 = vector.broadcast %33 : vector<1x1x4xf32> to vector<16x16x4xf32>
    %35 = arith.mulf %31, %34 : vector<16x16x4xf32>
    %36 = arith.addf %30, %35 : vector<16x16x4xf32>
    %37 = vector.extract_strided_slice %1 {offsets = [2, 0, 0], sizes = [16, 16, 4], strides = [1, 1, 1]} : vector<18x18x4xf32> to vector<16x16x4xf32>
    %c6 = arith.constant 6 : index
    %c0_10 = arith.constant 0 : index
    %38 = vector.load %arg2[%c6, %c0_10] : memref<9x4xf32, #tpu.memory_space<vmem>>, vector<1x4xf32>
    %39 = vector.shape_cast %38 : vector<1x4xf32> to vector<1x1x4xf32>
    %40 = vector.broadcast %39 : vector<1x1x4xf32> to vector<16x16x4xf32>
    %41 = arith.mulf %37, %40 : vector<16x16x4xf32>
    %42 = arith.addf %36, %41 : vector<16x16x4xf32>
    %43 = vector.extract_strided_slice %1 {offsets = [2, 1, 0], sizes = [16, 16, 4], strides = [1, 1, 1]} : vector<18x18x4xf32> to vector<16x16x4xf32>
    %c7 = arith.constant 7 : index
    %c0_11 = arith.constant 0 : index
    %44 = vector.load %arg2[%c7, %c0_11] : memref<9x4xf32, #tpu.memory_space<vmem>>, vector<1x4xf32>
    %45 = vector.shape_cast %44 : vector<1x4xf32> to vector<1x1x4xf32>
    %46 = vector.broadcast %45 : vector<1x1x4xf32> to vector<16x16x4xf32>
    %47 = arith.mulf %43, %46 : vector<16x16x4xf32>
    %48 = arith.addf %42, %47 : vector<16x16x4xf32>
    %49 = vector.extract_strided_slice %1 {offsets = [2, 2, 0], sizes = [16, 16, 4], strides = [1, 1, 1]} : vector<18x18x4xf32> to vector<16x16x4xf32>
    %c8 = arith.constant 8 : index
    %c0_12 = arith.constant 0 : index
    %50 = vector.load %arg2[%c8, %c0_12] : memref<9x4xf32, #tpu.memory_space<vmem>>, vector<1x4xf32>
    %51 = vector.shape_cast %50 : vector<1x4xf32> to vector<1x1x4xf32>
    %52 = vector.broadcast %51 : vector<1x1x4xf32> to vector<16x16x4xf32>
    %53 = arith.mulf %49, %52 : vector<16x16x4xf32>
    %54 = arith.addf %48, %53 : vector<16x16x4xf32>
    %c0_13 = arith.constant 0 : index
    %c0_14 = arith.constant 0 : index
    %55 = vector.load %arg3[%c0_13, %c0_14] : memref<1x4xf32, #tpu.memory_space<vmem>>, vector<1x4xf32>
    %56 = vector.shape_cast %55 : vector<1x4xf32> to vector<1x1x4xf32>
    %57 = vector.broadcast %56 : vector<1x1x4xf32> to vector<16x16x4xf32>
    %58 = arith.addf %54, %57 : vector<16x16x4xf32>
    %59 = vector.shape_cast %58 : vector<16x16x4xf32> to vector<256x4xf32>
    %c0_15 = arith.constant 0 : index
    %c0_16 = arith.constant 0 : index
    %60 = vector.load %arg4[%c0_15, %c0_16] : memref<4x8xf32, #tpu.memory_space<vmem>>, vector<4x8xf32>
    %cst = arith.constant dense<0.000000e+00> : vector<256x8xf32>
    %61 = tpu.matmul %59, %60, %cst {dimension_numbers = #tpu.dot_dimension_numbers<[1], [0], [0], [1], [0, 0, 1, 1], [], []>} : vector<256x4xf32>, vector<4x8xf32>, vector<256x8xf32> -> vector<256x8xf32>
    %c0_17 = arith.constant 0 : index
    %c0_18 = arith.constant 0 : index
    %62 = vector.load %arg5[%c0_17, %c0_18] : memref<1x8xf32, #tpu.memory_space<vmem>>, vector<1x8xf32>
    %63 = vector.broadcast %62 : vector<1x8xf32> to vector<256x8xf32>
    %64 = arith.addf %61, %63 : vector<256x8xf32>
    %65 = vector.shape_cast %64 : vector<256x8xf32> to vector<16x16x8xf32>
    %c0_19 = arith.constant 0 : index
    %c0_20 = arith.constant 0 : index
    %c0_21 = arith.constant 0 : index
    %c0_22 = arith.constant 0 : index
    %66 = vector.load %arg6[%c0_19, %c0_20, %c0_21, %c0_22] : memref<1x16x16x8xf32, #tpu.memory_space<vmem>>, vector<1x16x16x8xf32>
    %67 = vector.shape_cast %66 : vector<1x16x16x8xf32> to vector<16x16x8xf32>
    %68 = vector.shape_cast %65 : vector<16x16x8xf32> to vector<1x16x16x8xf32>
    tpu.vector_store %arg6[%c0_19, %c0_20, %c0_21, %c0_22], %68 {strides = array<i32>} : memref<1x16x16x8xf32, #tpu.memory_space<vmem>>, vector<1x16x16x8xf32>,
    return
  }
  func.func @transform_0(%arg0: i32) -> (i32, i32, i32, i32) {
    %c0_i32 = arith.constant 0 : i32
    %c0_i32_0 = arith.constant 0 : i32
    %c0_i32_1 = arith.constant 0 : i32
    %c0_i32_2 = arith.constant 0 : i32
    return %arg0, %c0_i32, %c0_i32_0, %c0_i32_1 : i32, i32, i32, i32
  }
  func.func @transform_1(%arg0: i32) -> (i32, i32) {
    %c0_i32 = arith.constant 0 : i32
    %c0_i32_0 = arith.constant 0 : i32
    %c0_i32_1 = arith.constant 0 : i32
    return %c0_i32, %c0_i32_0 : i32, i32
  }
  func.func @transform_2(%arg0: i32) -> (i32, i32) {
    %c0_i32 = arith.constant 0 : i32
    %c0_i32_0 = arith.constant 0 : i32
    %c0_i32_1 = arith.constant 0 : i32
    return %c0_i32, %c0_i32_0 : i32, i32
  }
  func.func @transform_3(%arg0: i32) -> (i32, i32) {
    %c0_i32 = arith.constant 0 : i32
    %c0_i32_0 = arith.constant 0 : i32
    %c0_i32_1 = arith.constant 0 : i32
    return %c0_i32, %c0_i32_0 : i32, i32
  }
  func.func @transform_4(%arg0: i32) -> (i32, i32) {
    %c0_i32 = arith.constant 0 : i32
    %c0_i32_0 = arith.constant 0 : i32
    %c0_i32_1 = arith.constant 0 : i32
    return %c0_i32, %c0_i32_0 : i32, i32
  }
  func.func @transform_5(%arg0: i32) -> (i32, i32, i32, i32) {
    %c0_i32 = arith.constant 0 : i32
    %c0_i32_0 = arith.constant 0 : i32
    %c0_i32_1 = arith.constant 0 : i32
    %c0_i32_2 = arith.constant 0 : i32
    return %arg0, %c0_i32, %c0_i32_0, %c0_i32_1 : i32, i32, i32, i32
  }
}

</mosaic_0001>

<bundles_post_ra>
// kernel: tpu_custom_call.1
= control target key start
LH: loop header
LB: loop body
LE: loop exit
PB: predicated region body
PF: predicated region fallthrough
CT: control target
= control target key end

     0   :  { %s2410_s18 = smov 0   ;;  %s4541_s0 = inlined_call_operand.vmem [shape: f32[2,18,18,4], index: 0, kind: input, shape index: {}]   ;;  %s4542_s1 = inlined_call_operand.vmem [shape: f32[9,4], index: 1, kind: input, shape index: {}]   ;;  %s4543_s2 = inlined_call_operand.vmem [shape: f32[1,4], index: 2, kind: input, shape index: {}]   ;;  %s4544_s3 = inlined_call_operand.vmem [shape: f32[4,8], index: 3, kind: input, shape index: {}]   ;;  %s4545_s4 = inlined_call_operand.vmem [shape: f32[1,8], index: 4, kind: input, shape index: {}]   ;;  %s4546_s5 = inlined_call_operand.vmem [shape: f32[2,16,16,8], index: 5, kind: output, shape index: {}]  }
   0x1 LB: > { %s2242_s19 = sadd.s32 4294967295, %s2378_s18   ;;  %p2246_p0 = scmp.ge.s32.totalorder %s2378_s18, 1  ;;  %s2378_s18 = sphi %s2410_s18, %s15_s18  }
   0x2   : > { %p187_p1 = scmp.lt.s32.totalorder %s2378_s18, 3 }
   0x4   : > { %p188_p2 = pnand %p2246_p0, %p187_p1 }
   0x6   : > { %191 = sbr.rel (%p188_p2) target bundleno = 470 (0x1d6), region = 40 }
   0xb   : > { %v1935_v0 = vld [vmem:[%s4544_s3] sm:$0xf]  ;;  %vm2037_vm0 = vcmask 1043456   ;;  %p215_p3 = scmp.lt.s32.totalorder %s2242_s19, 1  ;;  %v2447_v5 = vld [vmem:[%s4542_s1 + $0x4] ss:$0 sm:$0xff] }
   0xc   : > { %2287 = vmatpush.msk.msra.mxu2 %vm2037_vm0, %v1935_v0  ;;  %2288 = vmatpush.msk.msra.mxu3 %vm2037_vm0, %v1935_v0  ;;  %v2426_v1 = vld [vmem:[%s4542_s1] ss:$0 sm:$0xff]  ;;  %v2431_v2 = vld [vmem:[%s4542_s1 + $0x1] ss:$0 sm:$0xff]  ;;  %v2436_v3 = vld [vmem:[%s4542_s1 + $0x2] ss:$0 sm:$0xff] }
   0xd   : > { %s4893_s19 = smov (!%p215_p3, %s2242_s19), 1  ;;  %2250 = vmatpush.msk.msra.mxu0 %vm2037_vm0, %v1935_v0  ;;  %2286 = vmatpush.msk.msra.mxu1 %vm2037_vm0, %v1935_v0  ;;  %v2442_v4 = vld [vmem:[%s4542_s1 + $0x3] ss:$0 sm:$0xff]  ;;  %v2457_v6 = vld [vmem:[%s4542_s1 + $0x5] ss:$0 sm:$0xff]  ;;  %vm411_vm1 = vcmask 1046528  }
   0xe   : > { %s2289_s28 = smul.u32 432, %s4893_s19  ;;  %vm654_vm2 = vcmask 1045504   ;;  %v2479_v15 = vld [vmem:[%s4542_s1 + $0x6] ss:$0 sm:$0xff]  ;;  %v2484_v16 = vld [vmem:[%s4542_s1 + $0x7] ss:$0 sm:$0xff] }
   0xf   : > { %v2507_v26 = vld [vmem:[%s4542_s1 + $0x8] ss:$0 sm:$0xff]  ;;  %vm1940_vm3 = vcmask 31744   ;;  %s2285_s17 = sshll.u32 %s4893_s19, 8  ;;  %vm2154_vm4 = vcmask 64512  }
  0x10   : > { %s2452_s10 = scalar_lea.vmem %s4541_s0, %s2289_s28  ;;  %s4413_s23 = scalar_lea.vmem %s4546_s5, %s2285_s17 }
  0x11   : > { %v249_v7 = vld [vmem:[%s2452_s10 + $0xc0] sm:$0xff]  ;;  %v2461_v8 = vld [vmem:[%s2452_s10 + $0xc8] sm:$0xff]  ;;  %v2464_v9 = vld [vmem:[%s2452_s10 + $0xd8] sm:$0xff] }
  0x12   : > { %4708 = vst [vmem:[#allocation2_spill] sm:$0xff] %v2464_v9  ;;  %v2467_v10 = vld [vmem:[%s2452_s10 + $0xe0] sm:$0xff]  ;;  %v297_v11 = vmul.f32 %v2426_v1, %v249_v7  ;;  %v339_v12 = vmul.f32 %v2431_v2, %v249_v7  ;;  %v2473_v13 = vmul.f32 %v2431_v2, %v2461_v8  ;;  %v582_v14 = vmul.f32 %v2436_v3, %v249_v7  ;;  %v2487_v17 = vld [vmem:[%s2452_s10 + $0xf0] sm:$0xff]  ;;  %v2510_v27 = vld [vmem:[%s2452_s10 + $0xf8] sm:$0xff] }
  0x13   : > { %4709 = vst [vmem:[#allocation3_spill] sm:$0xff] %v2487_v17  ;;  %v2491_v18 = vmul.f32 %v2436_v3, %v2461_v8  ;;  %v817_v19 = vmul.f32 %v2442_v4, %v2464_v9  ;;  %v891_v20 = vmul.f32 %v2447_v5, %v2464_v9  ;;  %v2499_v21 = vmul.f32 %v2447_v5, %v2467_v10  ;;  %v261_v36 = vld [vmem:[%s2452_s10 + $0x120] sm:$0xff]  ;;  %v2534_v41 = vld [vmem:[%s2452_s10 + $0x128] sm:$0xff]  ;;  %v2550_v48 = vld [vmem:[%s2452_s10 + $0x138] sm:$0xff] }
  0x14   : > { %v452_v22 = vrot.slane %v339_v12, 1  ;;  %v4561_v23 = vrot.slane %v2473_v13, 1  ;;  %v695_v24 = vrot.slane %v582_v14, 2  ;;  %v1133_v25 = vmul.f32 %v2457_v6, %v2464_v9  ;;  %4710 = vst [vmem:[#allocation4_spill] sm:$0xff] %v2550_v48  ;;  %v2561_v56 = vld [vmem:[%s2452_s10 + $0x140] sm:$0xff]  ;;  %v2578_v7 = vld [vmem:[%s2452_s10 + $0x150] sm:$0xff] }
  0x15   : > { %v4560_v28 = vrot.slane %v2491_v18, 2  ;;  %v1003_v29 = vrot.slane %v891_v20, 1  ;;  %v4559_v30 = vrot.slane %v2499_v21, 1  ;;  %v2516_v31 = vmul.f32 %v2457_v6, %v2467_v10  ;;  %4711 = vst [vmem:[#allocation5_spill] sm:$0xff] %v2578_v7 }
  0x16   : > { %v454_v32 = vsel %vm411_vm1, %v452_v22, %v4561_v23  ;;  %v1245_v33 = vrot.slane %v1133_v25, 2  ;;  %v1367_v34 = vmul.f32 %v2479_v15, %v2487_v17  ;;  %v1441_v35 = vmul.f32 %v2484_v16, %v2487_v17 }
  0x17   : > { %v540_v37 = vadd.f32 %v454_v32, %v297_v11  ;;  %v697_v38 = vsel %vm654_vm2, %v695_v24, %v4560_v28  ;;  %v1005_v39 = vsel %vm411_vm1, %v1003_v29, %v4559_v30  ;;  %v4557_v40 = vrot.slane %v2516_v31, 2  ;;  %v2718_v30 = vld [vmem:[%s2452_s10 + $0x78] sm:$0xff] }
  0x18   : > { %v2538_v42 = vmul.f32 %v2484_v16, %v2510_v27  ;;  %v1553_v43 = vrot.slane %v1441_v35, 1  ;;  %v1683_v44 = vmul.f32 %v2507_v26, %v2487_v17  ;;  %v2544_v45 = vmul.f32 %v2507_v26, %v2510_v27  ;;  %4715 = vst [vmem:[#allocation9_spill] sm:$0xff] %v2718_v30 }
  0x19   : > { %v783_v46 = vadd.f32 %v697_v38, %v540_v37  ;;  %v1247_v47 = vsel %vm654_vm2, %v1245_v33, %v4557_v40  ;;  %v305_v49 = vmul.f32 %v2426_v1, %v261_v36  ;;  %v351_v50 = vmul.f32 %v2431_v2, %v261_v36 }
  0x1a   : > { %v4555_v51 = vrot.slane %v2538_v42, 1  ;;  %v1795_v52 = vrot.slane %v1683_v44, 2  ;;  %v4553_v53 = vrot.slane %v2544_v45, 2  ;;  %v2558_v54 = vmul.f32 %v2431_v2, %v2534_v41 }
  0x1b   : > { %v849_v55 = vadd.f32 %v817_v19, %v783_v46  ;;  %v472_v57 = vrot.slane %v351_v50, 1  ;;  %v594_v58 = vmul.f32 %v2436_v3, %v261_v36  ;;  %v2566_v59 = vmul.f32 %v2436_v3, %v2534_v41  ;;  %v2584_v19 = vld [vmem:[%s2452_s10 + $0x158] sm:$0xff] }
  0x1c   : > { %v1555_v60 = vsel %vm411_vm1, %v1553_v43, %v4555_v51  ;;  %v1797_v61 = vsel %vm654_vm2, %v1795_v52, %v4553_v53  ;;  %v4552_v62 = vrot.slane %v2558_v54, 1  ;;  %v825_v63 = vmul.f32 %v2442_v4, %v2550_v48 }
  0x1d   : > { %v1091_v0 = vadd.f32 %v1005_v39, %v849_v55  ;;  %v715_v11 = vrot.slane %v594_v58, 2  ;;  %v4551_v12 = vrot.slane %v2566_v59, 2  ;;  %v903_v14 = vmul.f32 %v2447_v5, %v2550_v48 }
  0x1e   : > { %v474_v20 = vsel %vm411_vm1, %v472_v57, %v4552_v62  ;;  %v2591_v22 = vmul.f32 %v2447_v5, %v2561_v56  ;;  %v1145_v24 = vmul.f32 %v2457_v6, %v2550_v48  ;;  %v2597_v25 = vmul.f32 %v2457_v6, %v2561_v56  ;;  %v2626_v57 = vld [vmem:[%s2452_s10 + $0x8] sm:$0xff] }
  0x1f   : > { %v1333_v29 = vadd.f32 %v1247_v47, %v1091_v0  ;;  %v548_v32 = vadd.f32 %v474_v20, %v305_v49  ;;  %v717_v33 = vsel %vm654_vm2, %v715_v11, %v4551_v12  ;;  %v1023_v35 = vrot.slane %v903_v14, 1  ;;  %v225_v49 = vld [vmem:[%s2452_s10] sm:$0xff] }
  0x20   : > { %v4549_v36 = vrot.slane %v2591_v22, 1  ;;  %v1265_v37 = vrot.slane %v1145_v24, 2  ;;  %v4547_v38 = vrot.slane %v2597_v25, 2  ;;  %v1375_v39 = vmul.f32 %v2479_v15, %v2578_v7  ;;  %v2631_v0 = vld [vmem:[%s4543_s2] ss:$0 sm:$0xff] }
  0x21   : > { %v1399_v43 = vadd.f32 %v1367_v34, %v1333_v29  ;;  %v791_v44 = vadd.f32 %v717_v33, %v548_v32  ;;  %v1453_v46 = vmul.f32 %v2484_v16, %v2578_v7  ;;  %v2610_v47 = vmul.f32 %v2484_v16, %v2584_v19  ;;  %v2636_v32 = vld [vmem:[%s2452_s10 + $0x18] sm:$0xff] }
  0x22   : > { %v1025_v50 = vsel %vm411_vm1, %v1023_v35, %v4549_v36  ;;  %v1267_v52 = vsel %vm654_vm2, %v1265_v37, %v4547_v38  ;;  %v1695_v34 = vmul.f32 %v2507_v26, %v2578_v7  ;;  %v2623_v55 = vmul.f32 %v2507_v26, %v2584_v19  ;;  %4712 = vst [vmem:[#allocation6_spill] sm:$0xff] %v2636_v32  ;;  %v2644_v38 = vld [vmem:[%s2452_s10 + $0x20] sm:$0xff]  ;;  %v2748_v7 = vld [vmem:[%s2452_s10 + $0x98] sm:$0xff] }
  0x23   : > { %v1641_v58 = vadd.f32 %v1555_v60, %v1399_v43  ;;  %v857_v11 = vadd.f32 %v825_v63, %v791_v44  ;;  %v1573_v14 = vrot.slane %v1453_v46, 1  ;;  %v4548_v20 = vrot.slane %v2610_v47, 1  ;;  %4719 = vst [vmem:[#allocation13_spill] sm:$0xff] %v2748_v7 }
  0x24   : > { %v1815_v24 = vrot.slane %v1695_v34, 2  ;;  %v4550_v29 = vrot.slane %v2623_v55, 2  ;;  %v281_v33 = vmul.f32 %v2426_v1, %v225_v49  ;;  %v315_v35 = vmul.f32 %v2431_v2, %v225_v49 }
  0x25   : > { %v1883_v37 = vadd.f32 %v1797_v61, %v1641_v58  ;;  %v1099_v60 = vadd.f32 %v1025_v50, %v857_v11  ;;  %v1575_v43 = vsel %vm411_vm1, %v1573_v14, %v4548_v20  ;;  %v2648_v63 = vmul.f32 %v2431_v2, %v2626_v57 }
  0x26   : > { %v1817_v44 = vsel %vm654_vm2, %v1815_v24, %v4550_v29  ;;  %v412_v46 = vrot.slane %v315_v35, 1  ;;  %v558_v61 = vmul.f32 %v2436_v3, %v225_v49  ;;  %v2656_v50 = vmul.f32 %v2436_v3, %v2626_v57 }
  0x27   : > { %v1919_v34 = vadd.f32 %v2631_v0, %v1883_v37  ;;  %v1341_v58 = vadd.f32 %v1267_v52, %v1099_v60  ;;  %v4554_v11 = vrot.slane %v2648_v63, 1  ;;  %v801_v14 = vmul.f32 %v2442_v4, %v2636_v32  ;;  %v2671_v37 = vld [vmem:[%s2452_s10 + $0x30] sm:$0xff]  ;;  %v2674_v52 = vld [vmem:[%s2452_s10 + $0x38] sm:$0xff] }
  0x28   : > { %v655_v20 = vrot.slane %v558_v61, 2  ;;  %v4556_v36 = vrot.slane %v2656_v50, 2  ;;  %v867_v24 = vmul.f32 %v2447_v5, %v2636_v32  ;;  %v2667_v49 = vmul.f32 %v2447_v5, %v2644_v38  ;;  %4713 = vst [vmem:[#allocation7_spill] sm:$0xff] %v2671_v37 }
  0x29   : > { %2267 = vmatmul.msk.f32.vlgmr.msra.gmra.mxu2 %vm1940_vm3, %v1919_v34  ;;  %v1407_v35 = vadd.f32 %v1375_v39, %v1341_v58  ;;  %v414_v60 = vsel %vm411_vm1, %v412_v46, %v4554_v11  ;;  %v1109_v61 = vmul.f32 %v2457_v6, %v2636_v32  ;;  %v2683_v29 = vmul.f32 %v2457_v6, %v2644_v38 }
  0x2a   : > { %v524_v12 = vadd.f32 %v414_v60, %v281_v33  ;;  %v657_v39 = vsel %vm654_vm2, %v655_v20, %v4556_v36  ;;  %v963_v34 = vrot.slane %v867_v24, 1  ;;  %v4558_v58 = vrot.slane %v2667_v49, 1  ;;  %v237_v20 = vld [vmem:[%s2452_s10 + $0x60] sm:$0xff] }
  0x2b   : > { %v1649_v62 = vadd.f32 %v1575_v43, %v1407_v35  ;;  %v1205_v53 = vrot.slane %v1109_v61, 2  ;;  %v4562_v46 = vrot.slane %v2683_v29, 2  ;;  %v1351_v51 = vmul.f32 %v2479_v15, %v2671_v37  ;;  %v2709_v61 = vld [vmem:[%s2452_s10 + $0x68] sm:$0xff] }
  0x2c   : > { %v767_v11 = vadd.f32 %v657_v39, %v524_v12  ;;  %v1417_v33 = vmul.f32 %v2484_v16, %v2671_v37  ;;  %v2696_v60 = vmul.f32 %v2484_v16, %v2674_v52  ;;  %v965_v43 = vsel %vm411_vm1, %v963_v34, %v4558_v58 }
  0x2d   : > { %v1891_v24 = vadd.f32 %v1817_v44, %v1649_v62  ;;  %v1659_v12 = vmul.f32 %v2507_v26, %v2671_v37  ;;  %v2706_v35 = vmul.f32 %v2507_v26, %v2674_v52  ;;  %v1207_v36 = vsel %vm654_vm2, %v1205_v53, %v4562_v46 }
  0x2e   : > { %v833_v39 = vadd.f32 %v801_v14, %v767_v11  ;;  %v1513_v40 = vrot.slane %v1417_v33, 1  ;;  %v4570_v62 = vrot.slane %v2696_v60, 1  ;;  %v327_v28 = vmul.f32 %v2431_v2, %v237_v20  ;;  %v2722_v11 = vld [vmem:[%s2452_s10 + $0x80] sm:$0xff] }
  0x2f   : > { %4714 = vst [vmem:[#allocation8_spill] sm:$0xff] %v2706_v35  ;;  %v1927_v44 = vadd.f32 %v2631_v0, %v1891_v24  ;;  %v1755_v34 = vrot.slane %v1659_v12, 2  ;;  %v4569_v58 = vrot.slane %v2706_v35, 2  ;;  %v289_v14 = vmul.f32 %v2426_v1, %v237_v20 }
  0x30   : > { %v1075_v23 = vadd.f32 %v965_v43, %v833_v39  ;;  %4716 = vst [vmem:[#allocation10_spill] sm:$0xff] %v2722_v11  ;;  %v2727_v53 = vmul.f32 %v2431_v2, %v2709_v61  ;;  %v570_v33 = vmul.f32 %v2436_v3, %v237_v20  ;;  %v1515_v24 = vsel %vm411_vm1, %v1513_v40, %v4570_v62 }
  0x31   : > { %2275 = vmatmul.msk.f32.vlgmr.msra.gmra.mxu3 %vm1940_vm3, %v1927_v44  ;;  %v1757_v43 = vsel %vm654_vm2, %v1755_v34, %v4569_v58  ;;  %v432_v12 = vrot.slane %v327_v28, 1  ;;  %v2739_v39 = vmul.f32 %v2436_v3, %v2709_v61  ;;  %v879_v20 = vmul.f32 %v2447_v5, %v2718_v30  ;;  %v2745_v44 = vld [vmem:[%s2452_s10 + $0x90] sm:$0xff] }
  0x32   : > { %v1317_v46 = vadd.f32 %v1207_v36, %v1075_v23  ;;  %v4580_v37 = vrot.slane %v2727_v53, 1  ;;  %v675_v32 = vrot.slane %v570_v33, 2  ;;  %4718 = vst [vmem:[#allocation12_spill] sm:$0xff] %v2745_v44  ;;  %v2753_v28 = vmul.f32 %v2447_v5, %v2722_v11 }
  0x33   : > { %4717 = vst [vmem:[#allocation11_spill] sm:$0xff] %v2739_v39  ;;  %v1121_v34 = vmul.f32 %v2457_v6, %v2718_v30  ;;  %v2759_v23 = vmul.f32 %v2457_v6, %v2722_v11  ;;  %v809_v58 = vmul.f32 %v2442_v4, %v2718_v30  ;;  %v983_v62 = vrot.slane %v879_v20, 1 }
  0x34   : > { %v1383_v36 = vadd.f32 %v1351_v51, %v1317_v46  ;;  %v434_v33 = vsel %vm411_vm1, %v432_v12, %v4580_v37  ;;  %v4720_v48 = vrot.slane %v2739_v39, 2  ;;  %v4591_v9 = vrot.slane %v2753_v28, 1 }
  0x35   : > { %v532_v40 = vadd.f32 %v434_v33, %v289_v14  ;;  %v1225_v35 = vrot.slane %v1121_v34, 2  ;;  %v4590_v51 = vrot.slane %v2759_v23, 2  ;;  %v1429_v46 = vmul.f32 %v2484_v16, %v2745_v44 }
  0x36   : > { %v677_v17 = vsel %vm654_vm2, %v675_v32, %v4720_v48  ;;  %v1625_v11 = vadd.f32 %v1515_v24, %v1383_v36  ;;  %v2775_v12 = vmul.f32 %v2484_v16, %v2748_v7  ;;  %v1359_v20 = vmul.f32 %v2479_v15, %v2745_v44  ;;  %v251_v24 = vld [vmem:[%s2452_s10 + $0xd0] sm:$0x3] }
  0x37   : > { %v775_v14 = vadd.f32 %v677_v17, %v532_v40  ;;  %v1671_v48 = vmul.f32 %v2507_v26, %v2745_v44  ;;  %v2783_v32 = vmul.f32 %v2507_v26, %v2748_v7  ;;  %v985_v36 = vsel %vm411_vm1, %v983_v62, %v4591_v9  ;;  %v2791_v17 = vld [vmem:[%s2452_s10 + $0xe8] sm:$0x3] }
  0x38   : > { %v1867_v34 = vadd.f32 %v1757_v43, %v1625_v11  ;;  %v1533_v33 = vrot.slane %v1429_v46, 1  ;;  %v4588_v37 = vrot.slane %v2775_v12, 1  ;;  %4722 = vst [vmem:[#allocation15_spill] sm:$0xff] %v2791_v17  ;;  %v1227_v44 = vsel %vm654_vm2, %v1225_v35, %v4590_v51  ;;  %v2799_v11 = vld [vmem:[%s2452_s10 + $0x100] sm:$0x3] }
  0x39   : > { %4721 = vst [vmem:[#allocation14_spill] sm:$0xff] %v2783_v32  ;;  %v841_v40 = vadd.f32 %v809_v58, %v775_v14  ;;  %v1775_v30 = vrot.slane %v1671_v48, 2  ;;  %v4589_v7 = vrot.slane %v2783_v32, 2  ;;  %v298_v62 = vmul.f32 %v2426_v1, %v2461_v8  ;;  %v2832_v32 = vld [vmem:[%s2452_s10 + $0x148] sm:$0x3] }
  0x3a   : > { %v1903_v39 = vadd.f32 %v2631_v0, %v1867_v34  ;;  %4723 = vst [vmem:[#allocation16_spill] sm:$0xff] %v2799_v11  ;;  %v341_v43 = vmul.f32 %v2431_v2, %v251_v24  ;;  %v584_v46 = vmul.f32 %v2436_v3, %v251_v24  ;;  %v1535_v35 = vsel %vm411_vm1, %v1533_v33, %v4588_v37 }
  0x3b   : > { %v1083_v58 = vadd.f32 %v985_v36, %v841_v40  ;;  %v1777_v14 = vsel %vm654_vm2, %v1775_v30, %v4589_v7  ;;  %v893_v48 = vmul.f32 %v2447_v5, %v2791_v17  ;;  %v818_v24 = vmul.f32 %v2442_v4, %v2467_v10  ;;  %v263_v7 = vld [vmem:[%s2452_s10 + $0x130] sm:$0x3] }
  0x3c   : > { %2251 = vmatmul.msk.f32.vlgmr.msra.gmra.mxu0 %vm1940_vm3, %v1903_v39  ;;  %v455_v8 = vrot.slane %v341_v43, 1  ;;  %v698_v34 = vrot.slane %v584_v46, 2  ;;  %v1135_v36 = vmul.f32 %v2457_v6, %v2791_v17  ;;  %v1443_v37 = vmul.f32 %v2484_v16, %v2799_v11 }
  0x3d   : > { %v1325_v40 = vadd.f32 %v1227_v44, %v1083_v58  ;;  %v1006_v33 = vrot.slane %v893_v48, 1  ;;  %v1685_v30 = vmul.f32 %v2507_v26, %v2799_v11  ;;  %v4724_v39 = vrot.slane %v2473_v13, 1 }
  0x3e   : > { %v4725_v46 = vrot.slane %v2491_v18, 2  ;;  %v1248_v9 = vrot.slane %v1135_v36, 2  ;;  %v1368_v44 = vmul.f32 %v2479_v15, %v2510_v27  ;;  %v1556_v17 = vrot.slane %v1443_v37, 1 }
  0x3f   : > { %v456_v43 = vsel %vm411_vm1, %v4724_v39, %v455_v8  ;;  %v1391_v58 = vadd.f32 %v1359_v20, %v1325_v40  ;;  %v306_v11 = vmul.f32 %v2426_v1, %v2534_v41  ;;  %v4726_v13 = vrot.slane %v2499_v21, 1  ;;  %v2848_v40 = vld [vmem:[%s2452_s10 + $0x160] sm:$0x3] }
  0x40   : > { %v699_v51 = vsel %vm654_vm2, %v4725_v46, %v698_v34  ;;  %v541_v48 = vadd.f32 %v456_v43, %v298_v62  ;;  %v1798_v18 = vrot.slane %v1685_v30, 2  ;;  %v353_v34 = vmul.f32 %v2431_v2, %v263_v7 }
  0x41   : > { %v1007_v8 = vsel %vm411_vm1, %v4726_v13, %v1006_v33  ;;  %v596_v36 = vmul.f32 %v2436_v3, %v263_v7  ;;  %v1633_v39 = vadd.f32 %v1535_v35, %v1391_v58  ;;  %v4727_v20 = vrot.slane %v2516_v31, 2 }
  0x42   : > { %v784_v46 = vadd.f32 %v699_v51, %v541_v48  ;;  %v4728_v62 = vrot.slane %v2538_v42, 1  ;;  %v475_v21 = vrot.slane %v353_v34, 1  ;;  %v826_v30 = vmul.f32 %v2442_v4, %v2561_v56 }
  0x43   : > { %v1249_v37 = vsel %vm654_vm2, %v4727_v20, %v1248_v9  ;;  %v718_v33 = vrot.slane %v596_v36, 2  ;;  %v905_v7 = vmul.f32 %v2447_v5, %v2832_v32  ;;  %v1875_v51 = vadd.f32 %v1777_v14, %v1633_v39 }
  0x44   : > { %v1557_v41 = vsel %vm411_vm1, %v4728_v62, %v1556_v17  ;;  %v850_v35 = vadd.f32 %v818_v24, %v784_v46  ;;  %v4729_v31 = vrot.slane %v2544_v45, 2  ;;  %v1147_v42 = vmul.f32 %v2457_v6, %v2832_v32  ;;  %v227_v24 = vld [vmem:[%s2452_s10 + $0x10] sm:$0x3]  ;;  %v2877_v62 = vld [vmem:[%s2452_s10 + $0x28] sm:$0x3] }
  0x45   : > { %v4730_v17 = vrot.slane %v2558_v54, 1  ;;  %v4731_v58 = vrot.slane %v2566_v59, 2  ;;  %v1026_v13 = vrot.slane %v905_v7, 1  ;;  %v1455_v14 = vmul.f32 %v2484_v16, %v2848_v40 }
  0x46   : > { %v1799_v9 = vsel %vm654_vm2, %v4729_v31, %v1798_v18  ;;  %v1911_v45 = vadd.f32 %v2631_v0, %v1875_v51  ;;  %v1092_v34 = vadd.f32 %v1007_v8, %v850_v35  ;;  %v1268_v36 = vrot.slane %v1147_v42, 2 }
  0x47   : > { %v476_v43 = vsel %vm411_vm1, %v4730_v17, %v475_v21  ;;  %v719_v48 = vsel %vm654_vm2, %v4731_v58, %v718_v33  ;;  %v4732_v39 = vrot.slane %v2591_v22, 1  ;;  %v1376_v59 = vmul.f32 %v2479_v15, %v2584_v19 }
  0x48   : > { %v549_v18 = vadd.f32 %v476_v43, %v306_v11  ;;  %v1576_v46 = vrot.slane %v1455_v14, 1  ;;  %v1697_v20 = vmul.f32 %v2507_v26, %v2848_v40  ;;  %2259 = vmatmul.msk.f32.vlgmr.msra.gmra.mxu1 %vm1940_vm3, %v1911_v45  ;;  %v1334_v21 = vadd.f32 %v1249_v37, %v1092_v34  ;;  %v2891_v37 = vld [vmem:[%s2452_s10 + $0x40] sm:$0x3] }
  0x49   : > { %v1027_v54 = vsel %vm411_vm1, %v4732_v39, %v1026_v13  ;;  %v282_v11 = vmul.f32 %v2426_v1, %v2626_v57  ;;  %v317_v22 = vmul.f32 %v2431_v2, %v227_v24  ;;  %v4733_v33 = vrot.slane %v2597_v25, 2 }
  0x4a   : > { %v792_v8 = vadd.f32 %v719_v48, %v549_v18  ;;  %v4734_v51 = vrot.slane %v2610_v47, 1  ;;  %v1818_v31 = vrot.slane %v1697_v20, 2  ;;  %v560_v42 = vmul.f32 %v2436_v3, %v227_v24  ;;  %v239_v20 = vld [vmem:[%s2452_s10 + $0x70] sm:$0x3] }
  0x4b   : > { %v1269_v7 = vsel %vm654_vm2, %v4733_v33, %v1268_v36  ;;  %v1400_v17 = vadd.f32 %v1368_v44, %v1334_v21  ;;  %v415_v58 = vrot.slane %v317_v22, 1  ;;  %v869_v57 = vmul.f32 %v2447_v5, %v2877_v62 }
  0x4c   : > { %v1577_v35 = vsel %vm411_vm1, %v4734_v51, %v1576_v46  ;;  %v858_v43 = vadd.f32 %v826_v30, %v792_v8  ;;  %v4735_v25 = vrot.slane %v2623_v55, 2  ;;  %v658_v13 = vrot.slane %v560_v42, 2 }
  0x4d   : > { %v802_v47 = vmul.f32 %v2442_v4, %v2644_v38  ;;  %v1111_v14 = vmul.f32 %v2457_v6, %v2877_v62  ;;  %v1642_v44 = vadd.f32 %v1557_v41, %v1400_v17  ;;  %v4736_v24 = vrot.slane %v2648_v63, 1 }
  0x4e   : > { %v1819_v48 = vsel %vm654_vm2, %v4735_v25, %v1818_v31  ;;  %v1100_v30 = vadd.f32 %v1027_v54, %v858_v43  ;;  %v966_v34 = vrot.slane %v869_v57, 1  ;;  %v4737_v55 = vrot.slane %v2656_v50, 2  ;;  %v2922_v31 = vld [vmem:[%s2452_s10 + $0x88] sm:$0x3]  ;;  %v2930_v57 = vld [vmem:[%s2452_s10 + $0xa0] sm:$0x3] }
  0x4f   : > { %v416_v45 = vsel %vm411_vm1, %v4736_v24, %v415_v58  ;;  %v1208_v39 = vrot.slane %v1111_v14, 2  ;;  %v1419_v46 = vmul.f32 %v2484_v16, %v2891_v37  ;;  %v1884_v21 = vadd.f32 %v1799_v9, %v1642_v44  ;;  %4741 = vst [vmem:[#allocation17_spill] sm:$0xff] %v2930_v57 }
  0x50   : > { %v525_v18 = vadd.f32 %v416_v45, %v282_v11  ;;  %v659_v36 = vsel %vm654_vm2, %v4737_v55, %v658_v13  ;;  %v1342_v41 = vadd.f32 %v1269_v7, %v1100_v30  ;;  %v1352_v63 = vmul.f32 %v2479_v15, %v2674_v52  ;;  %v4743_v30 = vld [vmem:[#allocation8_spill] sm:$0xff] }
  0x51   : > { %v1661_v54 = vmul.f32 %v2507_v26, %v2891_v37  ;;  %v4738_v11 = vrot.slane %v2667_v49, 1  ;;  %v4739_v22 = vrot.slane %v2683_v29, 2  ;;  %v1516_v51 = vrot.slane %v1419_v46, 1 }
  0x52   : > { %v768_v8 = vadd.f32 %v659_v36, %v525_v18  ;;  %v1920_v9 = vadd.f32 %v2631_v0, %v1884_v21  ;;  %v1408_v7 = vadd.f32 %v1376_v59, %v1342_v41  ;;  %v329_v17 = vmul.f32 %v2431_v2, %v239_v20  ;;  %v4742_v59 = vld [vmem:[#allocation10_spill] sm:$0xff]  ;;  %v4746_v21 = vld [vmem:[#allocation11_spill] sm:$0xff] }
  0x53   : > { %v967_v50 = vsel %vm411_vm1, %v4738_v11, %v966_v34  ;;  %v1209_v33 = vsel %vm654_vm2, %v4739_v22, %v1208_v39  ;;  %v1758_v42 = vrot.slane %v1661_v54, 2  ;;  %v4740_v58 = vrot.slane %v2696_v60, 1 }
  0x54   : > { %v834_v43 = vadd.f32 %v802_v47, %v768_v8  ;;  %v290_v29 = vmul.f32 %v2426_v1, %v2709_v61  ;;  %v572_v25 = vmul.f32 %v2436_v3, %v239_v20  ;;  %2268 = vmatmul.msk.f32.gmra.mxu2 %vm1940_vm3, %v1920_v9  ;;  %v1650_v13 = vadd.f32 %v1577_v35, %v1408_v7 }
  0x55   : > { %v1517_v49 = vsel %vm411_vm1, %v4740_v58, %v1516_v51  ;;  %v435_v14 = vrot.slane %v329_v17, 1  ;;  %v810_v44 = vmul.f32 %v2442_v4, %v4742_v59  ;;  %v881_v47 = vmul.f32 %v2447_v5, %v2922_v31 }
  0x56   : > { %v1076_v60 = vadd.f32 %v967_v50, %v834_v43  ;;  %v4744_v24 = vrot.slane %v4743_v30, 2  ;;  %v678_v34 = vrot.slane %v572_v25, 2  ;;  %v1123_v61 = vmul.f32 %v2457_v6, %v2922_v31  ;;  %v4748_v50 = vld [vmem:[#allocation13_spill] sm:$0xff] }
  0x57   : > { %v1892_v18 = vadd.f32 %v1819_v48, %v1650_v13  ;;  %v4745_v55 = vrot.slane %v2727_v53, 1  ;;  %v986_v36 = vrot.slane %v881_v47, 1  ;;  %v1431_v39 = vmul.f32 %v2484_v16, %v2930_v57 }
  0x58   : > { %v1759_v45 = vsel %vm654_vm2, %v4744_v24, %v1758_v42  ;;  %v1318_v46 = vadd.f32 %v1209_v33, %v1076_v60  ;;  %v4747_v41 = vrot.slane %v4746_v21, 2  ;;  %v1228_v8 = vrot.slane %v1123_v61, 2  ;;  %v4753_v24 = vld [vmem:[#allocation3_spill] sm:$0xff] }
  0x59   : > { %v436_v35 = vsel %vm411_vm1, %v4745_v55, %v435_v14  ;;  %v1928_v11 = vadd.f32 %v2631_v0, %v1892_v18  ;;  %v1360_v48 = vmul.f32 %v2479_v15, %v4748_v50  ;;  %v1536_v22 = vrot.slane %v1431_v39, 1 }
  0x5a   : > { %v533_v20 = vadd.f32 %v436_v35, %v290_v29  ;;  %v679_v54 = vsel %vm654_vm2, %v4747_v41, %v678_v34  ;;  %v1673_v53 = vmul.f32 %v2507_v26, %v2930_v57  ;;  %v1384_v51 = vadd.f32 %v1352_v63, %v1318_v46  ;;  %v4752_v29 = vld [vmem:[#allocation2_spill] sm:$0xff] }
  0x5b   : > { %v4749_v7 = vrot.slane %v2753_v28, 1  ;;  %v4750_v42 = vrot.slane %v2759_v23, 2  ;;  %2276 = vmatmul.msk.f32.gmra.mxu3 %vm1940_vm3, %v1928_v11  ;;  %v4751_v43 = vrot.slane %v2775_v12, 1  ;;  %v299_v25 = vmul.f32 %v2426_v1, %v4752_v29 }
  0x5c   : > { %v776_v9 = vadd.f32 %v679_v54, %v533_v20  ;;  %v342_v63 = vmul.f32 %v2431_v2, %v4752_v29  ;;  %v2974_v28 = vmul.f32 %v2431_v2, %v2467_v10  ;;  %v1626_v23 = vadd.f32 %v1517_v49, %v1384_v51  ;;  %v3002_v20 = vld [vmem:[%s2452_s10 + $0x110] sm:$0xff]  ;;  %v4755_v51 = vld [vmem:[#allocation14_spill] sm:$0xff] }
  0x5d   : > { %v987_v33 = vsel %vm411_vm1, %v4749_v7, %v986_v36  ;;  %v1229_v17 = vsel %vm654_vm2, %v4750_v42, %v1228_v8  ;;  %v1537_v58 = vsel %vm411_vm1, %v4751_v43, %v1536_v22  ;;  %v585_v14 = vmul.f32 %v2436_v3, %v4752_v29 }
  0x5e   : > { %v842_v13 = vadd.f32 %v810_v44, %v776_v9  ;;  %v2980_v12 = vmul.f32 %v2436_v3, %v2467_v10  ;;  %v1778_v47 = vrot.slane %v1673_v53, 2  ;;  %v457_v60 = vrot.slane %v342_v63, 1  ;;  %v2987_v44 = vld [vmem:[%s2452_s10 + $0x108] sm:$0xff] }
  0x5f   : > { %v4607_v30 = vrot.slane %v2974_v28, 1  ;;  %v819_v34 = vmul.f32 %v2442_v4, %v4753_v24  ;;  %v1868_v61 = vadd.f32 %v1759_v45, %v1626_v23  ;;  %v700_v55 = vrot.slane %v585_v14, 2  ;;  %4754 = vst [vmem:[#allocation10_spill] sm:$0xff] %v2987_v44 }
  0x60   : > { %v1084_v18 = vadd.f32 %v987_v33, %v842_v13  ;;  %v4606_v49 = vrot.slane %v2980_v12, 2  ;;  %v894_v35 = vmul.f32 %v2447_v5, %v4753_v24  ;;  %v2996_v36 = vmul.f32 %v2447_v5, %v2510_v27 }
  0x61   : > { %v459_v10 = vsel %vm411_vm1, %v457_v60, %v4607_v30  ;;  %v1136_v45 = vmul.f32 %v2457_v6, %v4753_v24  ;;  %v1904_v39 = vadd.f32 %v2631_v0, %v1868_v61  ;;  %v3010_v11 = vmul.f32 %v2457_v6, %v2510_v27 }
  0x62   : > { %v1326_v46 = vadd.f32 %v1229_v17, %v1084_v18  ;;  %v542_v21 = vadd.f32 %v459_v10, %v299_v25  ;;  %v702_v41 = vsel %vm654_vm2, %v700_v55, %v4606_v49  ;;  %v1008_v54 = vrot.slane %v894_v35, 1 }
  0x63   : > { %v4605_v8 = vrot.slane %v2996_v36, 1  ;;  %v1250_v22 = vrot.slane %v1136_v45, 2  ;;  %2252 = vmatmul.msk.f32.gmra.mxu0 %vm1940_vm3, %v1904_v39  ;;  %v4756_v9 = vrot.slane %v4755_v51, 2  ;;  %v1444_v42 = vmul.f32 %v2484_v16, %v2987_v44 }
  0x64   : > { %v1392_v53 = vadd.f32 %v1360_v48, %v1326_v46  ;;  %v785_v33 = vadd.f32 %v702_v41, %v542_v21  ;;  %v4604_v43 = vrot.slane %v3010_v11, 2  ;;  %v3024_v29 = vmul.f32 %v2484_v16, %v3002_v20 }
  0x65   : > { %v1779_v7 = vsel %vm654_vm2, %v4756_v9, %v1778_v47  ;;  %v1010_v17 = vsel %vm411_vm1, %v1008_v54, %v4605_v8  ;;  %v1686_v48 = vmul.f32 %v2507_v26, %v2987_v44  ;;  %v1558_v23 = vrot.slane %v1444_v42, 1  ;;  %v3067_v42 = vld [vmem:[%s2452_s10 + $0x170] sm:$0xff] }
  0x66   : > { %v1634_v25 = vadd.f32 %v1537_v58, %v1392_v53  ;;  %v851_v63 = vadd.f32 %v819_v34, %v785_v33  ;;  %v3030_v13 = vmul.f32 %v2507_v26, %v3002_v20  ;;  %v1252_v14 = vsel %vm654_vm2, %v1250_v22, %v4604_v43  ;;  %v4757_v34 = vld [vmem:[#allocation4_spill] sm:$0xff]  ;;  %v3064_v33 = vld [vmem:[%s2452_s10 + $0x168] sm:$0xff] }
  0x67   : > { %v1369_v47 = vmul.f32 %v2479_v15, %v2987_v44  ;;  %v4603_v60 = vrot.slane %v3024_v29, 1  ;;  %v1800_v24 = vrot.slane %v1686_v48, 2  ;;  %v354_v55 = vmul.f32 %v2431_v2, %v4757_v34  ;;  %4758 = vst [vmem:[#allocation8_spill] sm:$0xff] %v3064_v33  ;;  %v3146_v43 = vld [vmem:[%s2452_s10 + $0x50] sm:$0xff] }
  0x68   : > { %v1876_v61 = vadd.f32 %v1779_v7, %v1634_v25  ;;  %v1093_v18 = vadd.f32 %v1010_v17, %v851_v63  ;;  %v4602_v58 = vrot.slane %v3030_v13, 2  ;;  %v307_v10 = vmul.f32 %v2426_v1, %v4757_v34  ;;  %v4759_v17 = vld [vmem:[#allocation5_spill] sm:$0xff] }
  0x69   : > { %v3045_v35 = vmul.f32 %v2431_v2, %v2561_v56  ;;  %v597_v45 = vmul.f32 %v2436_v3, %v4757_v34  ;;  %v3051_v39 = vmul.f32 %v2436_v3, %v2561_v56  ;;  %v1560_v41 = vsel %vm411_vm1, %v1558_v23, %v4603_v60 }
  0x6a   : > { %v1912_v46 = vadd.f32 %v2631_v0, %v1876_v61  ;;  %v1335_v21 = vadd.f32 %v1252_v14, %v1093_v18  ;;  %v477_v54 = vrot.slane %v354_v55, 1  ;;  %v1802_v22 = vsel %vm654_vm2, %v1800_v24, %v4602_v58 }
  0x6b   : > { %v4601_v53 = vrot.slane %v3045_v35, 1  ;;  %v720_v51 = vrot.slane %v597_v45, 2  ;;  %v4597_v9 = vrot.slane %v3051_v39, 2  ;;  %v906_v48 = vmul.f32 %v2447_v5, %v4759_v17 }
  0x6c   : > { %2260 = vmatmul.msk.f32.gmra.mxu1 %vm1940_vm3, %v1912_v46  ;;  %v1401_v7 = vadd.f32 %v1369_v47, %v1335_v21  ;;  %v3073_v25 = vmul.f32 %v2447_v5, %v2584_v19  ;;  %v1148_v63 = vmul.f32 %v2457_v6, %v4759_v17  ;;  %v827_v47 = vmul.f32 %v2442_v4, %v4759_v17 }
  0x6d   : > { %v479_v23 = vsel %vm411_vm1, %v477_v54, %v4601_v53  ;;  %v722_v14 = vsel %vm654_vm2, %v720_v51, %v4597_v9  ;;  %v3087_v24 = vmul.f32 %v2457_v6, %v2584_v19  ;;  %v1028_v34 = vrot.slane %v906_v48, 1 }
  0x6e   : > { %v1643_v61 = vadd.f32 %v1560_v41, %v1401_v7  ;;  %v550_v18 = vadd.f32 %v479_v23, %v307_v10  ;;  %v4598_v55 = vrot.slane %v3073_v25, 1  ;;  %v1270_v45 = vrot.slane %v1148_v63, 2 }
  0x6f   : > { %v4600_v46 = vrot.slane %v3087_v24, 2  ;;  %v1456_v21 = vmul.f32 %v2484_v16, %v3064_v33  ;;  %v3095_v54 = vmul.f32 %v2484_v16, %v3067_v42  ;;  %v1377_v9 = vmul.f32 %v2479_v15, %v3064_v33 }
  0x70   : > { %v1885_v51 = vadd.f32 %v1802_v22, %v1643_v61  ;;  %v793_v17 = vadd.f32 %v722_v14, %v550_v18  ;;  %v1698_v10 = vmul.f32 %v2507_v26, %v3064_v33  ;;  %v1030_v41 = vsel %vm411_vm1, %v1028_v34, %v4598_v55  ;;  %v4760_v34 = vld [vmem:[#allocation6_spill] sm:$0xff] }
  0x71   : > { %v1578_v7 = vrot.slane %v1456_v21, 1  ;;  %v4599_v48 = vrot.slane %v3095_v54, 1  ;;  %v3107_v63 = vmul.f32 %v2507_v26, %v3067_v42  ;;  %v1272_v14 = vsel %vm654_vm2, %v1270_v45, %v4600_v46  ;;  %v4761_v46 = vld [vmem:[#allocation7_spill] sm:$0xff] }
  0x72   : > { %v1921_v22 = vadd.f32 %v2631_v0, %v1885_v51  ;;  %v859_v23 = vadd.f32 %v827_v47, %v793_v17  ;;  %v1820_v61 = vrot.slane %v1698_v10, 2  ;;  %v283_v21 = vmul.f32 %v2426_v1, %v4760_v34 }
  0x73   : > { %v1580_v18 = vsel %vm411_vm1, %v1578_v7, %v4599_v48  ;;  %v318_v55 = vmul.f32 %v2431_v2, %v4760_v34  ;;  %v3122_v47 = vmul.f32 %v2431_v2, %v2644_v38  ;;  %v561_v17 = vmul.f32 %v2436_v3, %v4760_v34 }
  0x74   : > { %2269 = vmatmul.msk.f32.gmra.mxu2 %vm1940_vm3, %v1921_v22  ;;  %v1101_v45 = vadd.f32 %v1030_v41, %v859_v23  ;;  %v3130_v10 = vmul.f32 %v2436_v3, %v2644_v38  ;;  %v803_v53 = vmul.f32 %v2442_v4, %v4761_v46  ;;  %v870_v58 = vmul.f32 %v2447_v5, %v4761_v46  ;;  %v3138_v41 = vld [vmem:[%s2452_s10 + $0x48] sm:$0xff] }
  0x75   : > { %v417_v7 = vrot.slane %v318_v55, 1  ;;  %v4610_v48 = vrot.slane %v3122_v47, 1  ;;  %4762 = vst [vmem:[#allocation11_spill] sm:$0xff] %v3138_v41  ;;  %v660_v23 = vrot.slane %v561_v17, 2  ;;  %v3143_v34 = vmul.f32 %v2447_v5, %v2674_v52 }
  0x76   : > { %v1343_v22 = vadd.f32 %v1272_v14, %v1101_v45  ;;  %v4617_v60 = vrot.slane %v3130_v10, 2  ;;  %v968_v8 = vrot.slane %v870_v58, 1  ;;  %v1112_v49 = vmul.f32 %v2457_v6, %v4761_v46 }
  0x77   : > { %v419_v55 = vsel %vm411_vm1, %v417_v7, %v4610_v48  ;;  %v3155_v14 = vmul.f32 %v2457_v6, %v2674_v52  ;;  %v4615_v51 = vrot.slane %v3143_v34, 1  ;;  %v4763_v33 = vrot.slane %v3107_v63, 2 }
  0x78   : > { %v1409_v45 = vadd.f32 %v1377_v9, %v1343_v22  ;;  %v526_v17 = vadd.f32 %v419_v55, %v283_v21  ;;  %v662_v30 = vsel %vm654_vm2, %v660_v23, %v4617_v60  ;;  %v1210_v58 = vrot.slane %v1112_v49, 2  ;;  %v3212_v60 = vld [vmem:[%s2452_s10 + $0xa8] sm:$0xff] }
  0x79   : > { %v1822_v7 = vsel %vm654_vm2, %v1820_v61, %v4763_v33  ;;  %v4616_v48 = vrot.slane %v3155_v14, 2  ;;  %v1420_v46 = vmul.f32 %v2484_v16, %v3138_v41  ;;  %v1353_v9 = vmul.f32 %v2479_v15, %v3138_v41  ;;  %4766 = vst [vmem:[#allocation13_spill] sm:$0xff] %v3212_v60 }
  0x7a   : > { %v1651_v44 = vadd.f32 %v1580_v18, %v1409_v45  ;;  %v769_v57 = vadd.f32 %v662_v30, %v526_v17  ;;  %v3171_v21 = vmul.f32 %v2484_v16, %v3146_v43  ;;  %v970_v22 = vsel %vm411_vm1, %v968_v8, %v4615_v51  ;;  %v4764_v17 = vld [vmem:[#allocation9_spill] sm:$0xff] }
  0x7b   : > { %v1518_v33 = vrot.slane %v1420_v46, 1  ;;  %v1662_v49 = vmul.f32 %v2507_v26, %v3138_v41  ;;  %v3180_v61 = vmul.f32 %v2507_v26, %v3146_v43  ;;  %v1212_v23 = vsel %vm654_vm2, %v1210_v58, %v4616_v48  ;;  %v3263_v41 = vld [vmem:[%s2452_s10 + $0x118] sm:$0x3] }
  0x7c   : > { %v1893_v30 = vadd.f32 %v1822_v7, %v1651_v44  ;;  %v835_v18 = vadd.f32 %v803_v53, %v769_v57  ;;  %v4618_v55 = vrot.slane %v3171_v21, 1  ;;  %v291_v8 = vmul.f32 %v2426_v1, %v4764_v17  ;;  %4772 = vst [vmem:[#allocation6_spill] sm:$0xff] %v3263_v41 }
  0x7d   : > { %v1760_v45 = vrot.slane %v1662_v49, 2  ;;  %v330_v46 = vmul.f32 %v2431_v2, %v4764_v17  ;;  %v3192_v51 = vmul.f32 %v2431_v2, %v4742_v59  ;;  %v4622_v53 = vrot.slane %v3180_v61, 2 }
  0x7e   : > { %v1929_v57 = vadd.f32 %v2631_v0, %v1893_v30  ;;  %v1077_v44 = vadd.f32 %v970_v22, %v835_v18  ;;  %v573_v7 = vmul.f32 %v2436_v3, %v4764_v17  ;;  %v1520_v1 = vsel %vm411_vm1, %v1518_v33, %v4618_v55  ;;  %v4765_v18 = vld [vmem:[#allocation12_spill] sm:$0xff] }
  0x7f   : > { %v437_v58 = vrot.slane %v330_v46, 1  ;;  %v4619_v49 = vrot.slane %v3192_v51, 1  ;;  %v3204_v2 = vmul.f32 %v2436_v3, %v4742_v59  ;;  %v811_v48 = vmul.f32 %v2442_v4, %v4765_v18  ;;  %v3225_v4 = vld [vmem:[%s2452_s10 + $0xb0] sm:$0xff] }
  0x80   : > { %2277 = vmatmul.msk.f32.gmra.mxu3 %vm1940_vm3, %v1929_v57  ;;  %v1319_v22 = vadd.f32 %v1212_v23, %v1077_v44  ;;  %v680_v30 = vrot.slane %v573_v7, 2  ;;  %v882_v17 = vmul.f32 %v2447_v5, %v4765_v18  ;;  %v3220_v3 = vmul.f32 %v2447_v5, %v4748_v50  ;;  %4768 = vst [vmem:[#allocation3_spill] sm:$0xff] %v3225_v4 }
  0x81   : > { %v439_v33 = vsel %vm411_vm1, %v437_v58, %v4619_v49  ;;  %v4621_v46 = vrot.slane %v3204_v2, 2  ;;  %v1124_v23 = vmul.f32 %v2457_v6, %v4765_v18  ;;  %v3229_v55 = vmul.f32 %v2457_v6, %v4748_v50 }
  0x82   : > { %4767 = vst [vmem:[#allocation2_spill] sm:$0xff] %v3220_v3  ;;  %v1385_v57 = vadd.f32 %v1353_v9, %v1319_v22  ;;  %v534_v44 = vadd.f32 %v439_v33, %v291_v8  ;;  %v988_v7 = vrot.slane %v882_v17, 1  ;;  %v1762_v58 = vsel %vm654_vm2, %v1760_v45, %v4622_v53 }
  0x83   : > { %4769 = vst [vmem:[#allocation14_spill] sm:$0xff] %v3229_v55  ;;  %v682_v5 = vsel %vm654_vm2, %v680_v30, %v4621_v46  ;;  %v4620_v49 = vrot.slane %v3220_v3, 1  ;;  %v1230_v18 = vrot.slane %v1124_v23, 2  ;;  %v4627_v8 = vrot.slane %v3229_v55, 2 }
  0x84   : > { %v1627_v9 = vadd.f32 %v1520_v1, %v1385_v57  ;;  %v777_v22 = vadd.f32 %v682_v5, %v534_v44  ;;  %v1432_v6 = vmul.f32 %v2484_v16, %v3212_v60  ;;  %v3246_v45 = vmul.f32 %v2484_v16, %v3225_v4 }
  0x85   : > { %v990_v17 = vsel %vm411_vm1, %v988_v7, %v4620_v49  ;;  %v1674_v30 = vmul.f32 %v2507_v26, %v3212_v60  ;;  %v3252_v1 = vmul.f32 %v2507_v26, %v3225_v4  ;;  %v1361_v57 = vmul.f32 %v2479_v15, %v3212_v60  ;;  %v3268_v15 = vld [vmem:[%s4542_s1 + $0x1] ss:$0 sm:$0xff]  ;;  %v3310_v60 = vld [vmem:[%s4542_s1 + $0x3] ss:$0 sm:$0xff]  ;;  %v3332_v4 = vld [vmem:[%s4542_s1 + $0x6] ss:$0 sm:$0xff] }
  0x86   : > { %4770 = vst [vmem:[#allocation4_spill] sm:$0xff] %v3246_v45  ;;  %v1869_v33 = vadd.f32 %v1762_v58, %v1627_v9  ;;  %v843_v23 = vadd.f32 %v811_v48, %v777_v22  ;;  %v1538_v44 = vrot.slane %v1432_v6, 1  ;;  %v1232_v7 = vsel %vm654_vm2, %v1230_v18, %v4627_v8  ;;  %v4773_v48 = vld [vmem:[#allocation15_spill] sm:$0xff]  ;;  %v3275_v18 = vld [vmem:[%s4542_s1 + $0x2] ss:$0 sm:$0xff] }
  0x87   : > { %4771 = vst [vmem:[#allocation5_spill] sm:$0xff] %v3252_v1  ;;  %v4625_v16 = vrot.slane %v3246_v45, 1  ;;  %v1780_v5 = vrot.slane %v1674_v30, 2  ;;  %v4626_v49 = vrot.slane %v3252_v1, 2  ;;  %v344_v58 = vmul.f32 %v3268_v15, %v4773_v48  ;;  %v2312_v30 = vld [vmem:[%s2452_s10 + $0xe0] sm:$0xff] }
  0x88   : > { %v1905_v46 = vadd.f32 %v2631_v0, %v1869_v33  ;;  %v1085_v53 = vadd.f32 %v990_v17, %v843_v23  ;;  %v587_v9 = vmul.f32 %v3275_v18, %v4773_v48  ;;  %v3288_v17 = vld [vmem:[%s4542_s1] ss:$0 sm:$0xff]  ;;  %v3295_v23 = vld [vmem:[%s4542_s1 + $0x4] ss:$0 sm:$0xff]  ;;  %v4774_v48 = vld [vmem:[#allocation16_spill] sm:$0xff]  ;;  %v820_v1 = vmul.f32 %v3310_v60, %v2510_v27 }
  0x89   : > { %v1540_v22 = vsel %vm411_vm1, %v1538_v44, %v4625_v16  ;;  %v1782_v6 = vsel %vm654_vm2, %v1780_v5, %v4626_v49  ;;  %v300_v33 = vmul.f32 %v2312_v30, %v3288_v17  ;;  %v896_v44 = vmul.f32 %v3295_v23, %v4774_v48  ;;  %v3303_v8 = vld [vmem:[%s4542_s1 + $0x5] ss:$0 sm:$0xff] }
  0x8a   : > { %2253 = vmatmul.msk.f32.gmra.mxu0 %vm1940_vm3, %v1905_v46  ;;  %v1327_v16 = vadd.f32 %v1232_v7, %v1085_v53  ;;  %v460_v5 = vrot.slane %v344_v58, 1  ;;  %v703_v49 = vrot.slane %v587_v9, 2  ;;  %v1138_v30 = vmul.f32 %v3303_v8, %v4774_v48  ;;  %v3317_v53 = vld [vmem:[%s4542_s1 + $0x7] ss:$0 sm:$0xff] }
  0x8b   : > { %v1011_v46 = vrot.slane %v896_v44, 1  ;;  %v1446_v7 = vmul.f32 %v3317_v53, %v3263_v41  ;;  %v1688_v58 = vmul.f32 %v2507_v26, %v3263_v41  ;;  %v4775_v48 = vrot.slane %v2974_v28, 1 }
  0x8c   : > { %v1393_v9 = vadd.f32 %v1361_v57, %v1327_v16  ;;  %v4776_v27 = vrot.slane %v2980_v12, 2  ;;  %v1253_v55 = vrot.slane %v1138_v30, 2  ;;  %v1370_v26 = vmul.f32 %v3332_v4, %v3002_v20 }
  0x8d   : > { %v461_v45 = vsel %vm411_vm1, %v4775_v48, %v460_v5  ;;  %v1561_v41 = vrot.slane %v1446_v7, 1  ;;  %v1803_v57 = vrot.slane %v1688_v58, 2  ;;  %v4777_v28 = vrot.slane %v2996_v36, 1 }
  0x8e   : > { %v704_v44 = vsel %vm654_vm2, %v4776_v27, %v703_v49  ;;  %v543_v3 = vadd.f32 %v461_v45, %v300_v33  ;;  %v1635_v16 = vadd.f32 %v1540_v22, %v1393_v9  ;;  %v4778_v12 = vrot.slane %v3010_v11, 2  ;;  %v3348_v27 = vld [vmem:[%s2452_s10 + $0x178] sm:$0x3] }
  0x8f   : > { %v1012_v5 = vsel %vm411_vm1, %v4777_v28, %v1011_v46  ;;  %v356_v45 = vmul.f32 %v3268_v15, %v2832_v32  ;;  %v4779_v30 = vrot.slane %v3024_v29, 1  ;;  %v308_v22 = vmul.f32 %v3288_v17, %v2561_v56 }
  0x90   : > { %v1254_v49 = vsel %vm654_vm2, %v4778_v12, %v1253_v55  ;;  %v786_v33 = vadd.f32 %v704_v44, %v543_v3  ;;  %v599_v36 = vmul.f32 %v3275_v18, %v2832_v32  ;;  %v1877_v46 = vadd.f32 %v1782_v6, %v1635_v16 }
  0x91   : > { %v1562_v48 = vsel %vm411_vm1, %v4779_v30, %v1561_v41  ;;  %v4780_v11 = vrot.slane %v3030_v13, 2  ;;  %v480_v7 = vrot.slane %v356_v45, 1  ;;  %v908_v3 = vmul.f32 %v3295_v23, %v2848_v40 }
  0x92   : > { %v852_v29 = vadd.f32 %v820_v1, %v786_v33  ;;  %v723_v58 = vrot.slane %v599_v36, 2  ;;  %v828_v41 = vmul.f32 %v3310_v60, %v2584_v19  ;;  %v1150_v56 = vmul.f32 %v3303_v8, %v2848_v40 }
  0x93   : > { %v1804_v55 = vsel %vm654_vm2, %v4780_v11, %v1803_v57  ;;  %v1913_v9 = vadd.f32 %v2631_v0, %v1877_v46  ;;  %v4781_v32 = vrot.slane %v3045_v35, 1  ;;  %v1031_v6 = vrot.slane %v908_v3, 1 }
  0x94   : > { %v1458_v44 = vmul.f32 %v3317_v53, %v3348_v27  ;;  %v1094_v57 = vadd.f32 %v1012_v5, %v852_v29  ;;  %v4782_v1 = vrot.slane %v3051_v39, 2  ;;  %v1273_v19 = vrot.slane %v1150_v56, 2  ;;  %v3381_v5 = vld [vmem:[%s4542_s1 + $0x8] ss:$0 sm:$0xff]  ;;  %v3398_v56 = vld [vmem:[%s2452_s10 + $0x58] sm:$0x3] }
  0x95   : > { %v481_v13 = vsel %vm411_vm1, %v4781_v32, %v480_v7  ;;  %2261 = vmatmul.msk.f32.gmra.mxu1 %vm1940_vm3, %v1913_v9  ;;  %v4783_v40 = vrot.slane %v3073_v25, 1  ;;  %v1378_v12 = vmul.f32 %v3332_v4, %v3067_v42  ;;  %v1700_v39 = vmul.f32 %v3381_v5, %v3348_v27 }
  0x96   : > { %v551_v16 = vadd.f32 %v481_v13, %v308_v22  ;;  %v724_v28 = vsel %vm654_vm2, %v4782_v1, %v723_v58  ;;  %v1581_v45 = vrot.slane %v1458_v44, 1  ;;  %v1336_v33 = vadd.f32 %v1254_v49, %v1094_v57 }
  0x97   : > { %v1032_v35 = vsel %vm411_vm1, %v4783_v40, %v1031_v6  ;;  %v284_v25 = vmul.f32 %v3288_v17, %v2644_v38  ;;  %v320_v22 = vmul.f32 %v3268_v15, %v2877_v62  ;;  %v4784_v36 = vrot.slane %v3087_v24, 2 }
  0x98   : > { %v794_v30 = vadd.f32 %v724_v28, %v551_v16  ;;  %v4785_v11 = vrot.slane %v3095_v54, 1  ;;  %v1823_v3 = vrot.slane %v1700_v39, 2  ;;  %v563_v29 = vmul.f32 %v3275_v18, %v2877_v62 }
  0x99   : > { %v1274_v46 = vsel %vm654_vm2, %v4784_v36, %v1273_v19  ;;  %v1402_v49 = vadd.f32 %v1370_v26, %v1336_v33  ;;  %v420_v38 = vrot.slane %v320_v22, 1  ;;  %v872_v9 = vmul.f32 %v3295_v23, %v2891_v37 }
  0x9a   : > { %v1582_v7 = vsel %vm411_vm1, %v4785_v11, %v1581_v45  ;;  %v860_v58 = vadd.f32 %v828_v41, %v794_v30  ;;  %v4786_v24 = vrot.slane %v3107_v63, 2  ;;  %v663_v13 = vrot.slane %v563_v29, 2 }
  0x9b   : > { %v804_v54 = vmul.f32 %v3310_v60, %v2674_v52  ;;  %v1114_v6 = vmul.f32 %v3303_v8, %v2891_v37  ;;  %v1644_v62 = vadd.f32 %v1562_v48, %v1402_v49  ;;  %v4787_v41 = vrot.slane %v3122_v47, 1  ;;  %v4793_v49 = vld [vmem:[#allocation17_spill] sm:$0xff] }
  0x9c   : > { %v1824_v32 = vsel %vm654_vm2, %v4786_v24, %v1823_v3  ;;  %v1102_v26 = vadd.f32 %v1032_v35, %v860_v58  ;;  %v971_v57 = vrot.slane %v872_v9, 1  ;;  %v4788_v1 = vrot.slane %v3130_v10, 2 }
  0x9d   : > { %v421_v44 = vsel %vm411_vm1, %v4787_v41, %v420_v38  ;;  %v1213_v28 = vrot.slane %v1114_v6, 2  ;;  %v1422_v52 = vmul.f32 %v3317_v53, %v3398_v56  ;;  %v1886_v19 = vadd.f32 %v1804_v55, %v1644_v62 }
  0x9e   : > { %v527_v16 = vadd.f32 %v421_v44, %v284_v25  ;;  %v664_v63 = vsel %vm654_vm2, %v4788_v1, %v663_v13  ;;  %v1344_v40 = vadd.f32 %v1274_v46, %v1102_v26  ;;  %v1354_v37 = vmul.f32 %v3332_v4, %v3146_v43  ;;  %v4797_v44 = vld [vmem:[#allocation3_spill] sm:$0xff] }
  0x9f   : > { %v1664_v47 = vmul.f32 %v3381_v5, %v3398_v56  ;;  %v4789_v35 = vrot.slane %v3143_v34, 1  ;;  %v4790_v45 = vrot.slane %v3155_v14, 2  ;;  %v1521_v33 = vrot.slane %v1422_v52, 1  ;;  %v3434_v34 = vld [vmem:[%s2452_s10 + $0xb8] sm:$0x3] }
  0xa0   : > { %v770_v48 = vadd.f32 %v664_v63, %v527_v16  ;;  %v1922_v30 = vadd.f32 %v2631_v0, %v1886_v19  ;;  %v1410_v55 = vadd.f32 %v1378_v12, %v1344_v40  ;;  %v332_v22 = vmul.f32 %v3268_v15, %v2922_v31  ;;  %4792 = vst [vmem:[#allocation7_spill] sm:$0xff] %v3434_v34  ;;  %v4800_v40 = vld [vmem:[#allocation14_spill] sm:$0xff] }
  0xa1   : > { %v972_v10 = vsel %vm411_vm1, %v4789_v35, %v971_v57  ;;  %v1214_v39 = vsel %vm654_vm2, %v4790_v45, %v1213_v28  ;;  %v1763_v25 = vrot.slane %v1664_v47, 2  ;;  %v4791_v46 = vrot.slane %v3171_v21, 1  ;;  %v4798_v28 = vld [vmem:[#allocation2_spill] sm:$0xff]  ;;  %v4802_v35 = vld [vmem:[#allocation4_spill] sm:$0xff] }
  0xa2   : > { %v836_v36 = vadd.f32 %v804_v54, %v770_v48  ;;  %v292_v14 = vmul.f32 %v3288_v17, %v4742_v59  ;;  %v575_v3 = vmul.f32 %v3275_v18, %v2922_v31  ;;  %2270 = vmatmul.msk.f32.gmra.mxu2 %vm1940_vm3, %v1922_v30  ;;  %v1652_v0 = vadd.f32 %v1582_v7, %v1410_v55  ;;  %v3482_v30 = vld [vmem:[%s2452_s10 + $0xf8] sm:$0xff] }
  0xa3   : > { %v1522_v11 = vsel %vm411_vm1, %v4791_v46, %v1521_v33  ;;  %v440_v12 = vrot.slane %v332_v22, 1  ;;  %v812_v29 = vmul.f32 %v3310_v60, %v4748_v50  ;;  %v884_v21 = vmul.f32 %v3295_v23, %v4793_v49 }
  0xa4   : > { %v1078_v58 = vadd.f32 %v972_v10, %v836_v36  ;;  %v4794_v38 = vrot.slane %v3180_v61, 2  ;;  %v683_v24 = vrot.slane %v575_v3, 2  ;;  %v1126_v59 = vmul.f32 %v3303_v8, %v4793_v49 }
  0xa5   : > { %v1894_v31 = vadd.f32 %v1824_v32, %v1652_v0  ;;  %v4795_v13 = vrot.slane %v3192_v51, 1  ;;  %v991_v54 = vrot.slane %v884_v21, 1  ;;  %v1434_v50 = vmul.f32 %v3317_v53, %v3434_v34  ;;  %v3461_v32 = vld [vmem:[%s4543_s2] ss:$0 sm:$0xff] }
  0xa6   : > { %v1764_v9 = vsel %vm654_vm2, %v4794_v38, %v1763_v25  ;;  %v1320_v6 = vadd.f32 %v1214_v39, %v1078_v58  ;;  %v4796_v61 = vrot.slane %v3204_v2, 2  ;;  %v1233_v41 = vrot.slane %v1126_v59, 2  ;;  %v2320_v39 = vld [vmem:[%s2452_s10 + $0xf0] sm:$0xff] }
  0xa7   : > { %v441_v7 = vsel %vm411_vm1, %v4795_v13, %v440_v12  ;;  %v1930_v51 = vadd.f32 %v3461_v32, %v1894_v31  ;;  %v1362_v57 = vmul.f32 %v3332_v4, %v4797_v44  ;;  %v1541_v16 = vrot.slane %v1434_v50, 1  ;;  %v4804_v12 = vld [vmem:[#allocation10_spill] sm:$0xff] }
  0xa8   : > { %v535_v62 = vadd.f32 %v441_v7, %v292_v14  ;;  %v684_v26 = vsel %vm654_vm2, %v4796_v61, %v683_v24  ;;  %v1676_v1 = vmul.f32 %v3381_v5, %v3434_v34  ;;  %v1386_v63 = vadd.f32 %v1354_v37, %v1320_v6 }
  0xa9   : > { %v4799_v52 = vrot.slane %v4798_v28, 1  ;;  %v4801_v47 = vrot.slane %v4800_v40, 2  ;;  %2278 = vmatmul.msk.f32.gmra.mxu3 %vm1940_vm3, %v1930_v51  ;;  %v4803_v10 = vrot.slane %v4802_v35, 1  ;;  %v301_v33 = vmul.f32 %v2320_v39, %v3288_v17 }
  0xaa   : > { %v778_v2 = vadd.f32 %v684_v26, %v535_v62  ;;  %v345_v37 = vmul.f32 %v2320_v39, %v3268_v15  ;;  %v3486_v55 = vmul.f32 %v3482_v30, %v3268_v15  ;;  %v1628_v25 = vadd.f32 %v1522_v11, %v1386_v63  ;;  %v3522_v63 = vld [vmem:[%s2452_s10 + $0x120] sm:$0xff] }
  0xab   : > { %v992_v19 = vsel %vm411_vm1, %v4799_v52, %v991_v54  ;;  %v1234_v48 = vsel %vm654_vm2, %v4801_v47, %v1233_v41  ;;  %v1542_v45 = vsel %vm411_vm1, %v4803_v10, %v1541_v16  ;;  %v588_v36 = vmul.f32 %v2320_v39, %v3275_v18  ;;  %v4805_v41 = vld [vmem:[#allocation5_spill] sm:$0xff]  ;;  %4807 = vst [vmem:[#allocation9_spill] sm:$0xff] %v3522_v63 }
  0xac   : > { %v844_v22 = vadd.f32 %v812_v29, %v778_v2  ;;  %v3491_v46 = vmul.f32 %v3482_v30, %v3275_v18  ;;  %v1783_v14 = vrot.slane %v1676_v1, 2  ;;  %v462_v3 = vrot.slane %v345_v37, 1 }
  0xad   : > { %v4652_v0 = vrot.slane %v3486_v55, 1  ;;  %v821_v49 = vmul.f32 %v3310_v60, %v4804_v12  ;;  %v1870_v21 = vadd.f32 %v1764_v9, %v1628_v25  ;;  %v705_v38 = vrot.slane %v588_v36, 2 }
  0xae   : > { %v1086_v58 = vadd.f32 %v992_v19, %v844_v22  ;;  %v4650_v24 = vrot.slane %v3491_v46, 2  ;;  %v897_v29 = vmul.f32 %v3295_v23, %v4804_v12  ;;  %v3504_v59 = vmul.f32 %v3295_v23, %v3002_v20  ;;  %v3531_v19 = vld [vmem:[%s2452_s10 + $0x128] sm:$0xff] }
  0xaf   : > { %v464_v11 = vsel %vm411_vm1, %v462_v3, %v4652_v0  ;;  %v1139_v31 = vmul.f32 %v3303_v8, %v4804_v12  ;;  %v1906_v9 = vadd.f32 %v3461_v32, %v1870_v21  ;;  %v3515_v62 = vmul.f32 %v3303_v8, %v3002_v20 }
  0xb0   : > { %v1328_v13 = vadd.f32 %v1234_v48, %v1086_v58  ;;  %v544_v7 = vadd.f32 %v464_v11, %v301_v33  ;;  %v707_v54 = vsel %vm654_vm2, %v705_v38, %v4650_v24  ;;  %v1013_v50 = vrot.slane %v897_v29, 1  ;;  %v2330_v24 = vld [vmem:[%s2452_s10 + $0x90] sm:$0xff] }
  0xb1   : > { %v4649_v6 = vrot.slane %v3504_v59, 1  ;;  %v1255_v61 = vrot.slane %v1139_v31, 2  ;;  %2254 = vmatmul.msk.f32.gmra.mxu0 %vm1940_vm3, %v1906_v9  ;;  %v4806_v51 = vrot.slane %v4805_v41, 2  ;;  %v1447_v2 = vmul.f32 %v3522_v63, %v3317_v53  ;;  %v3579_v41 = vld [vmem:[%s2452_s10 + $0x188] sm:$0xff] }
  0xb2   : > { %v1394_v26 = vadd.f32 %v1362_v57, %v1328_v13  ;;  %v787_v1 = vadd.f32 %v707_v54, %v544_v7  ;;  %v4648_v52 = vrot.slane %v3515_v62, 2  ;;  %v3535_v57 = vmul.f32 %v3531_v19, %v3317_v53 }
  0xb3   : > { %v1784_v16 = vsel %vm654_vm2, %v4806_v51, %v1783_v14  ;;  %v1015_v28 = vsel %vm411_vm1, %v1013_v50, %v4649_v6  ;;  %v1689_v40 = vmul.f32 %v3522_v63, %v3381_v5  ;;  %v1563_v35 = vrot.slane %v1447_v2, 1  ;;  %v2324_v14 = vld [vmem:[%s2452_s10 + $0x150] sm:$0xff] }
  0xb4   : > { %v1636_v47 = vadd.f32 %v1542_v45, %v1394_v26  ;;  %v853_v48 = vadd.f32 %v821_v49, %v787_v1  ;;  %v3541_v10 = vmul.f32 %v3531_v19, %v3381_v5  ;;  %v1257_v39 = vsel %vm654_vm2, %v1255_v61, %v4648_v52  ;;  %v3554_v49 = vld [vmem:[%s2452_s10 + $0x158] sm:$0xff]  ;;  %v3576_v26 = vld [vmem:[%s2452_s10 + $0x180] sm:$0xff]  ;;  %v4809_v51 = vld [vmem:[#allocation8_spill] sm:$0xff] }
  0xb5   : > { %v1371_v33 = vmul.f32 %v3522_v63, %v3332_v4  ;;  %v4644_v37 = vrot.slane %v3535_v57, 1  ;;  %v1805_v25 = vrot.slane %v1689_v40, 2  ;;  %v357_v3 = vmul.f32 %v2324_v14, %v3268_v15  ;;  %4808 = vst [vmem:[#allocation12_spill] sm:$0xff] %v3576_v26 }
  0xb6   : > { %v1878_v22 = vadd.f32 %v1784_v16, %v1636_v47  ;;  %v1095_v36 = vadd.f32 %v1015_v28, %v853_v48  ;;  %v4643_v45 = vrot.slane %v3541_v10, 2  ;;  %v309_v12 = vmul.f32 %v2324_v14, %v3288_v17 }
  0xb7   : > { %v3558_v21 = vmul.f32 %v3554_v49, %v3268_v15  ;;  %v600_v58 = vmul.f32 %v2324_v14, %v3275_v18  ;;  %v3563_v38 = vmul.f32 %v3554_v49, %v3275_v18  ;;  %v1565_v31 = vsel %vm411_vm1, %v1563_v35, %v4644_v37 }
  0xb8   : > { %v1914_v11 = vadd.f32 %v3461_v32, %v1878_v22  ;;  %v1337_v29 = vadd.f32 %v1257_v39, %v1095_v36  ;;  %v482_v9 = vrot.slane %v357_v3, 1  ;;  %v1807_v13 = vsel %vm654_vm2, %v1805_v25, %v4643_v45 }
  0xb9   : > { %v4642_v7 = vrot.slane %v3558_v21, 1  ;;  %v725_v54 = vrot.slane %v600_v58, 2  ;;  %v4641_v50 = vrot.slane %v3563_v38, 2  ;;  %v909_v16 = vmul.f32 %v3295_v23, %v4809_v51 }
  0xba   : > { %2262 = vmatmul.msk.f32.gmra.mxu1 %vm1940_vm3, %v1914_v11  ;;  %v1403_v61 = vadd.f32 %v1371_v33, %v1337_v29  ;;  %v3585_v1 = vmul.f32 %v3295_v23, %v3067_v42  ;;  %v1151_v2 = vmul.f32 %v3303_v8, %v4809_v51  ;;  %v829_v47 = vmul.f32 %v3310_v60, %v4809_v51 }
  0xbb   : > { %v484_v28 = vsel %vm411_vm1, %v482_v9, %v4642_v7  ;;  %v727_v40 = vsel %vm654_vm2, %v725_v54, %v4641_v50  ;;  %v3599_v48 = vmul.f32 %v3303_v8, %v3067_v42  ;;  %v1033_v33 = vrot.slane %v909_v16, 1 }
  0xbc   : > { %v1645_v35 = vadd.f32 %v1565_v31, %v1403_v61  ;;  %v552_v39 = vadd.f32 %v484_v28, %v309_v12  ;;  %v4640_v25 = vrot.slane %v3585_v1, 1  ;;  %v1275_v22 = vrot.slane %v1151_v2, 2 }
  0xbd   : > { %v4639_v36 = vrot.slane %v3599_v48, 2  ;;  %v1459_v14 = vmul.f32 %v3317_v53, %v3576_v26  ;;  %v3607_v3 = vmul.f32 %v3317_v53, %v3579_v41  ;;  %v1379_v12 = vmul.f32 %v3332_v4, %v3576_v26 }
  0xbe   : > { %v1887_v58 = vadd.f32 %v1807_v13, %v1645_v35  ;;  %v795_v11 = vadd.f32 %v727_v40, %v552_v39  ;;  %v1701_v29 = vmul.f32 %v3381_v5, %v3576_v26  ;;  %v1035_v31 = vsel %vm411_vm1, %v1033_v33, %v4640_v25  ;;  %v2326_v40 = vld [vmem:[%s2452_s10 + $0x30] sm:$0xff]  ;;  %v3632_v33 = vld [vmem:[%s2452_s10 + $0x38] sm:$0xff] }
  0xbf   : > { %v1583_v9 = vrot.slane %v1459_v14, 1  ;;  %v4638_v54 = vrot.slane %v3607_v3, 1  ;;  %v3619_v61 = vmul.f32 %v3381_v5, %v3579_v41  ;;  %v1277_v16 = vsel %vm654_vm2, %v1275_v22, %v4639_v36 }
  0xc0   : > { %v1923_v13 = vadd.f32 %v3461_v32, %v1887_v58  ;;  %v861_v51 = vadd.f32 %v829_v47, %v795_v11  ;;  %v1825_v2 = vrot.slane %v1701_v29, 2  ;;  %v285_v35 = vmul.f32 %v2326_v40, %v3288_v17 }
  0xc1   : > { %v1585_v28 = vsel %vm411_vm1, %v1583_v9, %v4638_v54  ;;  %v321_v39 = vmul.f32 %v2326_v40, %v3268_v15  ;;  %v3636_v14 = vmul.f32 %v3632_v33, %v3268_v15  ;;  %v4647_v22 = vrot.slane %v3619_v61, 2  ;;  %v4810_v54 = vld [vmem:[#allocation11_spill] sm:$0xff] }
  0xc2   : > { %2271 = vmatmul.msk.f32.gmra.mxu2 %vm1940_vm3, %v1923_v13  ;;  %v1103_v47 = vadd.f32 %v1035_v31, %v861_v51  ;;  %v564_v58 = vmul.f32 %v2326_v40, %v3275_v18  ;;  %v3643_v11 = vmul.f32 %v3632_v33, %v3275_v18  ;;  %v805_v36 = vmul.f32 %v3310_v60, %v4810_v54 }
  0xc3   : > { %v422_v29 = vrot.slane %v321_v39, 1  ;;  %v4645_v9 = vrot.slane %v3636_v14, 1  ;;  %v873_v25 = vmul.f32 %v3295_v23, %v4810_v54  ;;  %v3653_v40 = vmul.f32 %v3295_v23, %v3146_v43 }
  0xc4   : > { %v1345_v13 = vadd.f32 %v1277_v16, %v1103_v47  ;;  %v665_v31 = vrot.slane %v564_v58, 2  ;;  %v4646_v51 = vrot.slane %v3643_v11, 2  ;;  %v1115_v7 = vmul.f32 %v3303_v8, %v4810_v54  ;;  %v3673_v54 = vld [vmem:[%s2452_s10 + $0x60] sm:$0xff] }
  0xc5   : > { %v424_v39 = vsel %vm411_vm1, %v422_v29, %v4645_v9  ;;  %v973_v50 = vrot.slane %v873_v25, 1  ;;  %v3662_v45 = vmul.f32 %v3303_v8, %v3146_v43  ;;  %v4651_v37 = vrot.slane %v3653_v40, 1  ;;  %4811 = vst [vmem:[#allocation15_spill] sm:$0xff] %v3673_v54 }
  0xc6   : > { %v1411_v16 = vadd.f32 %v1379_v12, %v1345_v13  ;;  %v528_v47 = vadd.f32 %v424_v39, %v285_v35  ;;  %v667_v58 = vsel %vm654_vm2, %v665_v31, %v4646_v51  ;;  %v1827_v29 = vsel %vm654_vm2, %v1825_v2, %v4647_v22  ;;  %v3680_v39 = vld [vmem:[%s2452_s10 + $0x68] sm:$0xff] }
  0xc7   : > { %v1215_v25 = vrot.slane %v1115_v7, 2  ;;  %v4653_v9 = vrot.slane %v3662_v45, 2  ;;  %v1423_v12 = vmul.f32 %v3673_v54, %v3317_v53  ;;  %v1355_v31 = vmul.f32 %v3673_v54, %v3332_v4 }
  0xc8   : > { %v1653_v35 = vadd.f32 %v1585_v28, %v1411_v16  ;;  %v771_v13 = vadd.f32 %v667_v58, %v528_v47  ;;  %v3684_v2 = vmul.f32 %v3680_v39, %v3317_v53  ;;  %v975_v7 = vsel %vm411_vm1, %v973_v50, %v4651_v37  ;;  %v3703_v37 = vld [vmem:[%s2452_s10 + $0x98] sm:$0xff] }
  0xc9   : > { %v1523_v51 = vrot.slane %v1423_v12, 1  ;;  %v1665_v22 = vmul.f32 %v3673_v54, %v3381_v5  ;;  %v3693_v28 = vmul.f32 %v3680_v39, %v3381_v5  ;;  %v1217_v58 = vsel %vm654_vm2, %v1215_v25, %v4653_v9  ;;  %4812 = vst [vmem:[#allocation16_spill] sm:$0xff] %v3703_v37 }
  0xca   : > { %v1895_v16 = vadd.f32 %v1827_v29, %v1653_v35  ;;  %v837_v47 = vadd.f32 %v805_v36, %v771_v13  ;;  %v4658_v52 = vrot.slane %v3684_v2, 1  ;;  %v293_v50 = vmul.f32 %v2330_v24, %v3288_v17 }
  0xcb   : > { %v1765_v6 = vrot.slane %v1665_v22, 2  ;;  %v333_v12 = vmul.f32 %v2330_v24, %v3268_v15  ;;  %v3707_v0 = vmul.f32 %v3703_v37, %v3268_v15  ;;  %v576_v25 = vmul.f32 %v2330_v24, %v3275_v18 }
  0xcc   : > { %v1931_v36 = vadd.f32 %v3461_v32, %v1895_v16  ;;  %v1079_v29 = vadd.f32 %v975_v7, %v837_v47  ;;  %v1525_v22 = vsel %vm411_vm1, %v1523_v51, %v4658_v52  ;;  %v3718_v54 = vmul.f32 %v3703_v37, %v3275_v18  ;;  %v4815_v7 = vld [vmem:[#allocation13_spill] sm:$0xff] }
  0xcd   : > { %4813 = vst [vmem:[#allocation17_spill] sm:$0xff] %v3707_v0  ;;  %v442_v13 = vrot.slane %v333_v12, 1  ;;  %v4661_v9 = vrot.slane %v3707_v0, 1  ;;  %v685_v16 = vrot.slane %v576_v25, 2  ;;  %v813_v47 = vmul.f32 %v3310_v60, %v4815_v7 }
  0xce   : > { %4814 = vst [vmem:[#allocation3_spill] sm:$0xff] %v3718_v54  ;;  %2279 = vmatmul.msk.f32.gmra.mxu3 %vm1940_vm3, %v1931_v36  ;;  %v1321_v26 = vadd.f32 %v1217_v58, %v1079_v29  ;;  %v885_v24 = vmul.f32 %v3295_v23, %v4815_v7  ;;  %v4667_v12 = vrot.slane %v3718_v54, 2  ;;  %v3731_v52 = vmul.f32 %v3295_v23, %v4797_v44  ;;  %v2334_v54 = vld [vmem:[%s2452_s10 + $0x100] sm:$0x3] }
  0xcf   : > { %v444_v51 = vsel %vm411_vm1, %v442_v13, %v4661_v9  ;;  %v1127_v58 = vmul.f32 %v3303_v8, %v4815_v7  ;;  %v3737_v35 = vmul.f32 %v3303_v8, %v4797_v44  ;;  %v4817_v63 = vrot.slane %v3693_v28, 2 }
  0xd0   : > { %4816 = vst [vmem:[#allocation2_spill] sm:$0xff] %v3731_v52  ;;  %v1387_v36 = vadd.f32 %v1355_v31, %v1321_v26  ;;  %v536_v29 = vadd.f32 %v444_v51, %v293_v50  ;;  %v993_v25 = vrot.slane %v885_v24, 1  ;;  %v687_v9 = vsel %vm654_vm2, %v685_v16, %v4667_v12  ;;  %v3748_v31 = vld [vmem:[%s2452_s10 + $0xc0] sm:$0xff] }
  0xd1   : > { %v1767_v13 = vsel %vm654_vm2, %v1765_v6, %v4817_v63  ;;  %v4666_v0 = vrot.slane %v3731_v52, 1  ;;  %v1235_v34 = vrot.slane %v1127_v58, 2  ;;  %v4674_v26 = vrot.slane %v3737_v35, 2  ;;  %4818 = vst [vmem:[#allocation14_spill] sm:$0xff] %v3748_v31  ;;  %v3756_v63 = vld [vmem:[%s2452_s10 + $0xc8] sm:$0xff] }
  0xd2   : > { %v1629_v37 = vadd.f32 %v1525_v22, %v1387_v36  ;;  %v779_v7 = vadd.f32 %v687_v9, %v536_v29  ;;  %v1435_v50 = vmul.f32 %v3748_v31, %v3317_v53  ;;  %4819 = vst [vmem:[#allocation4_spill] sm:$0xff] %v3756_v63  ;;  %v3760_v16 = vmul.f32 %v3756_v63, %v3317_v53 }
  0xd3   : > { %v995_v6 = vsel %vm411_vm1, %v993_v25, %v4666_v0  ;;  %v1677_v9 = vmul.f32 %v3748_v31, %v3381_v5  ;;  %v3766_v22 = vmul.f32 %v3756_v63, %v3381_v5  ;;  %v1363_v58 = vmul.f32 %v3748_v31, %v3332_v4 }
  0xd4   : > { %v1871_v24 = vadd.f32 %v1767_v13, %v1629_v37  ;;  %v845_v51 = vadd.f32 %v813_v47, %v779_v7  ;;  %v1543_v36 = vrot.slane %v1435_v50, 1  ;;  %v1237_v29 = vsel %vm654_vm2, %v1235_v34, %v4674_v26  ;;  %v4821_v50 = vld [vmem:[#allocation6_spill] sm:$0xff] }
  0xd5   : > { %4820 = vst [vmem:[#allocation10_spill] sm:$0xff] %v3766_v22  ;;  %v4672_v25 = vrot.slane %v3760_v16, 1  ;;  %v1785_v0 = vrot.slane %v1677_v9, 2  ;;  %v4673_v12 = vrot.slane %v3766_v22, 2  ;;  %v347_v37 = vmul.f32 %v2334_v54, %v3268_v15 }
  0xd6   : > { %v1907_v52 = vadd.f32 %v3461_v32, %v1871_v24  ;;  %v1087_v63 = vadd.f32 %v995_v6, %v845_v51  ;;  %v590_v47 = vmul.f32 %v2334_v54, %v3275_v18  ;;  %v302_v7 = vmul.f32 %v3482_v30, %v3288_v17 }
  0xd7   : > { %v1545_v13 = vsel %vm411_vm1, %v1543_v36, %v4672_v25  ;;  %v1787_v34 = vsel %vm654_vm2, %v1785_v0, %v4673_v12  ;;  %v899_v9 = vmul.f32 %v3295_v23, %v4821_v50  ;;  %v465_v24 = vrot.slane %v347_v37, 1  ;;  %v3795_v0 = vld [vmem:[%s2452_s10 + $0x130] sm:$0x3] }
  0xd8   : > { %2255 = vmatmul.msk.f32.gmra.mxu0 %vm1940_vm3, %v1907_v52  ;;  %v1329_v6 = vadd.f32 %v1237_v29, %v1087_v63  ;;  %v708_v51 = vrot.slane %v590_v47, 2  ;;  %v1141_v54 = vmul.f32 %v3303_v8, %v4821_v50  ;;  %v822_v36 = vmul.f32 %v3310_v60, %v3002_v20  ;;  %4822 = vst [vmem:[#allocation5_spill] sm:$0xff] %v3795_v0 }
  0xd9   : > { %v1016_v25 = vrot.slane %v899_v9, 1  ;;  %v1449_v30 = vmul.f32 %v3795_v0, %v3317_v53  ;;  %v1691_v12 = vmul.f32 %v3795_v0, %v3381_v5  ;;  %v4823_v63 = vrot.slane %v3486_v55, 1 }
  0xda   : > { %v1395_v52 = vadd.f32 %v1363_v58, %v1329_v6  ;;  %v4824_v37 = vrot.slane %v3491_v46, 2  ;;  %v1258_v47 = vrot.slane %v1141_v54, 2  ;;  %v1372_v9 = vmul.f32 %v3531_v19, %v3332_v4 }
  0xdb   : > { %v466_v29 = vsel %vm411_vm1, %v4823_v63, %v465_v24  ;;  %v1566_v26 = vrot.slane %v1449_v30, 1  ;;  %v1808_v31 = vrot.slane %v1691_v12, 2  ;;  %v4825_v0 = vrot.slane %v3504_v59, 1  ;;  %v2336_v24 = vld [vmem:[%s2452_s10 + $0x160] sm:$0x3] }
  0xdc   : > { %v709_v20 = vsel %vm654_vm2, %v4824_v37, %v708_v51  ;;  %v545_v50 = vadd.f32 %v466_v29, %v302_v7  ;;  %v1637_v22 = vadd.f32 %v1545_v13, %v1395_v52  ;;  %v4826_v55 = vrot.slane %v3515_v62, 2  ;;  %v3821_v63 = vld [vmem:[%s2452_s10 + $0x190] sm:$0x3] }
  0xdd   : > { %v1017_v58 = vsel %vm411_vm1, %v4825_v0, %v1016_v25  ;;  %v359_v46 = vmul.f32 %v2336_v24, %v3268_v15  ;;  %v4827_v7 = vrot.slane %v3535_v57, 1  ;;  %v310_v12 = vmul.f32 %v3554_v49, %v3288_v17 }
  0xde   : > { %v1259_v6 = vsel %vm654_vm2, %v4826_v55, %v1258_v47  ;;  %v788_v51 = vadd.f32 %v709_v20, %v545_v50  ;;  %v602_v59 = vmul.f32 %v2336_v24, %v3275_v18  ;;  %v1879_v25 = vadd.f32 %v1787_v34, %v1637_v22 }
  0xdf   : > { %v1567_v54 = vsel %vm411_vm1, %v4827_v7, %v1566_v26  ;;  %v4828_v62 = vrot.slane %v3541_v10, 2  ;;  %v485_v0 = vrot.slane %v359_v46, 1  ;;  %v911_v30 = vmul.f32 %v3295_v23, %v3348_v27 }
  0xe0   : > { %v854_v52 = vadd.f32 %v822_v36, %v788_v51  ;;  %v728_v57 = vrot.slane %v602_v59, 2  ;;  %v830_v26 = vmul.f32 %v3310_v60, %v3067_v42  ;;  %v1153_v29 = vmul.f32 %v3303_v8, %v3348_v27  ;;  %v2337_v51 = vld [vmem:[%s2452_s10 + $0x40] sm:$0x3] }
  0xe1   : > { %v1809_v13 = vsel %vm654_vm2, %v4828_v62, %v1808_v31  ;;  %v1915_v49 = vadd.f32 %v3461_v32, %v1879_v25  ;;  %v4829_v22 = vrot.slane %v3558_v21, 1  ;;  %v1036_v31 = vrot.slane %v911_v30, 1 }
  0xe2   : > { %v1461_v34 = vmul.f32 %v3317_v53, %v3821_v63  ;;  %v1096_v37 = vadd.f32 %v1017_v58, %v854_v52  ;;  %v4830_v20 = vrot.slane %v3563_v38, 2  ;;  %v1278_v47 = vrot.slane %v1153_v29, 2 }
  0xe3   : > { %v486_v10 = vsel %vm411_vm1, %v4829_v22, %v485_v0  ;;  %2263 = vmatmul.msk.f32.gmra.mxu1 %vm1940_vm3, %v1915_v49  ;;  %v4831_v27 = vrot.slane %v3585_v1, 1  ;;  %v1380_v50 = vmul.f32 %v3332_v4, %v3579_v41  ;;  %v1703_v24 = vmul.f32 %v3381_v5, %v3821_v63 }
  0xe4   : > { %v553_v36 = vadd.f32 %v486_v10, %v310_v12  ;;  %v729_v42 = vsel %vm654_vm2, %v4830_v20, %v728_v57  ;;  %v1586_v55 = vrot.slane %v1461_v34, 1  ;;  %v1338_v58 = vadd.f32 %v1259_v6, %v1096_v37  ;;  %v3879_v20 = vld [vmem:[%s2452_s10 + $0x70] sm:$0x3] }
  0xe5   : > { %v1037_v21 = vsel %vm411_vm1, %v4831_v27, %v1036_v31  ;;  %v286_v38 = vmul.f32 %v3632_v33, %v3288_v17  ;;  %v323_v7 = vmul.f32 %v2337_v51, %v3268_v15  ;;  %v4832_v12 = vrot.slane %v3599_v48, 2 }
  0xe6   : > { %v796_v46 = vadd.f32 %v729_v42, %v553_v36  ;;  %v4833_v59 = vrot.slane %v3607_v3, 1  ;;  %v1828_v62 = vrot.slane %v1703_v24, 2  ;;  %v566_v0 = vmul.f32 %v2337_v51, %v3275_v18 }
  0xe7   : > { %v1279_v1 = vsel %vm654_vm2, %v4832_v12, %v1278_v47  ;;  %v1404_v6 = vadd.f32 %v1372_v9, %v1338_v58  ;;  %v425_v52 = vrot.slane %v323_v7, 1  ;;  %v875_v33 = vmul.f32 %v3295_v23, %v3398_v56 }
  0xe8   : > { %v1587_v25 = vsel %vm411_vm1, %v4833_v59, %v1586_v55  ;;  %v862_v30 = vadd.f32 %v830_v26, %v796_v46  ;;  %v4834_v57 = vrot.slane %v3619_v61, 2  ;;  %v668_v29 = vrot.slane %v566_v0, 2 }
  0xe9   : > { %v806_v3 = vmul.f32 %v3310_v60, %v3146_v43  ;;  %v1117_v49 = vmul.f32 %v3303_v8, %v3398_v56  ;;  %v1646_v22 = vadd.f32 %v1567_v54, %v1404_v6  ;;  %v4835_v9 = vrot.slane %v3636_v14, 1  ;;  %v4841_v6 = vld [vmem:[#allocation7_spill] sm:$0xff] }
  0xea   : > { %v1829_v48 = vsel %vm654_vm2, %v4834_v57, %v1828_v62  ;;  %v1104_v10 = vadd.f32 %v1037_v21, %v862_v30  ;;  %v976_v31 = vrot.slane %v875_v33, 1  ;;  %v4836_v37 = vrot.slane %v3643_v11, 2 }
  0xeb   : > { %v426_v26 = vsel %vm411_vm1, %v4835_v9, %v425_v52  ;;  %v1218_v36 = vrot.slane %v1117_v49, 2  ;;  %v1425_v43 = vmul.f32 %v3879_v20, %v3317_v53  ;;  %v1888_v56 = vadd.f32 %v1809_v13, %v1646_v22  ;;  %v4843_v49 = vld [vmem:[#allocation17_spill] sm:$0xff]  ;;  %v3916_v9 = vld [vmem:[%s2452_s10 + $0xd0] sm:$0x3] }
  0xec   : > { %v529_v34 = vadd.f32 %v426_v26, %v286_v38  ;;  %v669_v61 = vsel %vm654_vm2, %v4836_v37, %v668_v29  ;;  %v1346_v54 = vadd.f32 %v1279_v1, %v1104_v10  ;;  %v1356_v14 = vmul.f32 %v3680_v39, %v3332_v4  ;;  %v2339_v38 = vld [vmem:[%s2452_s10 + $0xa0] sm:$0x3]  ;;  %v4840_v1 = vld [vmem:[#allocation16_spill] sm:$0xff] }
  0xed   : > { %v1667_v42 = vmul.f32 %v3879_v20, %v3381_v5  ;;  %v4837_v11 = vrot.slane %v3653_v40, 1  ;;  %v4838_v21 = vrot.slane %v3662_v45, 2  ;;  %v1526_v24 = vrot.slane %v1425_v43, 1 }
  0xee   : > { %v772_v47 = vadd.f32 %v669_v61, %v529_v34  ;;  %v1924_v58 = vadd.f32 %v3461_v32, %v1888_v56  ;;  %v1412_v13 = vadd.f32 %v1380_v50, %v1346_v54  ;;  %v335_v51 = vmul.f32 %v2339_v38, %v3268_v15 }
  0xef   : > { %v977_v27 = vsel %vm411_vm1, %v4837_v11, %v976_v31  ;;  %v1219_v55 = vsel %vm654_vm2, %v4838_v21, %v1218_v36  ;;  %v1768_v46 = vrot.slane %v1667_v42, 2  ;;  %v4839_v12 = vrot.slane %v3684_v2, 1  ;;  %v4845_v31 = vld [vmem:[#allocation3_spill] sm:$0xff]  ;;  %v4847_v36 = vld [vmem:[#allocation4_spill] sm:$0xff]  ;;  %v4848_v11 = vld [vmem:[#allocation2_spill] sm:$0xff] }
  0xf0   : > { %v838_v7 = vadd.f32 %v806_v3, %v772_v47  ;;  %v294_v59 = vmul.f32 %v4840_v1, %v3288_v17  ;;  %v578_v45 = vmul.f32 %v2339_v38, %v3275_v18  ;;  %2272 = vmatmul.msk.f32.gmra.mxu2 %vm1940_vm3, %v1924_v58  ;;  %v1654_v62 = vadd.f32 %v1587_v25, %v1412_v13 }
  0xf1   : > { %v1527_v40 = vsel %vm411_vm1, %v4839_v12, %v1526_v24  ;;  %v445_v0 = vrot.slane %v335_v51, 1  ;;  %v814_v50 = vmul.f32 %v3310_v60, %v4797_v44  ;;  %v887_v30 = vmul.f32 %v3295_v23, %v4841_v6  ;;  %v3942_v51 = vld [vmem:[%s2452_s10 + $0x110] sm:$0xff] }
  0xf2   : > { %v1080_v52 = vadd.f32 %v977_v27, %v838_v7  ;;  %v4842_v2 = vrot.slane %v3693_v28, 2  ;;  %v688_v57 = vrot.slane %v578_v45, 2  ;;  %v1129_v29 = vmul.f32 %v3303_v8, %v4841_v6 }
  0xf3   : > { %v1896_v3 = vadd.f32 %v1829_v48, %v1654_v62  ;;  %v4844_v22 = vrot.slane %v4843_v49, 1  ;;  %v996_v10 = vrot.slane %v887_v30, 1  ;;  %v1437_v44 = vmul.f32 %v3916_v9, %v3317_v53 }
  0xf4   : > { %v1769_v33 = vsel %vm654_vm2, %v4842_v2, %v1768_v46  ;;  %v1322_v26 = vadd.f32 %v1219_v55, %v1080_v52  ;;  %v4846_v34 = vrot.slane %v4845_v31, 2  ;;  %v1238_v61 = vrot.slane %v1129_v29, 2  ;;  %v2341_v46 = vld [vmem:[%s2452_s10 + $0x108] sm:$0xff] }
  0xf5   : > { %v446_v25 = vsel %vm411_vm1, %v4844_v22, %v445_v0  ;;  %v1932_v48 = vadd.f32 %v3461_v32, %v1896_v3  ;;  %v1364_v43 = vmul.f32 %v4847_v36, %v3332_v4  ;;  %v1546_v56 = vrot.slane %v1437_v44, 1  ;;  %v4852_v0 = vld [vmem:[#allocation9_spill] sm:$0xff] }
  0xf6   : > { %v537_v28 = vadd.f32 %v446_v25, %v294_v59  ;;  %v689_v37 = vsel %vm654_vm2, %v4846_v34, %v688_v57  ;;  %v1679_v54 = vmul.f32 %v3916_v9, %v3381_v5  ;;  %v1388_v42 = vadd.f32 %v1356_v14, %v1322_v26  ;;  %v4853_v34 = vld [vmem:[#allocation10_spill] sm:$0xff] }
  0xf7   : > { %v4849_v27 = vrot.slane %v4848_v11, 1  ;;  %v4850_v55 = vrot.slane %v3737_v35, 2  ;;  %2280 = vmatmul.msk.f32.gmra.mxu3 %vm1940_vm3, %v1932_v48  ;;  %v4851_v58 = vrot.slane %v3760_v16, 1  ;;  %v303_v38 = vmul.f32 %v2341_v46, %v3288_v17  ;;  %v3988_v11 = vld [vmem:[%s2452_s10 + $0x140] sm:$0xff] }
  0xf8   : > { %v780_v47 = vadd.f32 %v689_v37, %v537_v28  ;;  %v348_v14 = vmul.f32 %v2341_v46, %v3268_v15  ;;  %v3946_v7 = vmul.f32 %v3942_v51, %v3268_v15  ;;  %v1630_v35 = vadd.f32 %v1527_v40, %v1388_v42 }
  0xf9   : > { %v997_v21 = vsel %vm411_vm1, %v4849_v27, %v996_v10  ;;  %v1239_v24 = vsel %vm654_vm2, %v4850_v55, %v1238_v61  ;;  %v1547_v13 = vsel %vm411_vm1, %v4851_v58, %v1546_v56  ;;  %v591_v1 = vmul.f32 %v2341_v46, %v3275_v18  ;;  %v2343_v56 = vld [vmem:[%s2452_s10 + $0x138] sm:$0xff] }
  0xfa   : > { %v846_v12 = vadd.f32 %v814_v50, %v780_v47  ;;  %v3951_v16 = vmul.f32 %v3942_v51, %v3275_v18  ;;  %v1788_v59 = vrot.slane %v1679_v54, 2  ;;  %v467_v45 = vrot.slane %v348_v14, 1 }
  0xfb   : > { %v4697_v62 = vrot.slane %v3946_v7, 1  ;;  %v823_v6 = vmul.f32 %v4852_v0, %v3310_v60  ;;  %v1872_v30 = vadd.f32 %v1769_v33, %v1630_v35  ;;  %v710_v2 = vrot.slane %v591_v1, 2 }
  0xfc   : > { %v1088_v52 = vadd.f32 %v997_v21, %v846_v12  ;;  %v4695_v57 = vrot.slane %v3951_v16, 2  ;;  %v900_v50 = vmul.f32 %v4852_v0, %v3295_v23  ;;  %v3964_v29 = vmul.f32 %v3531_v19, %v3295_v23 }
  0xfd   : > { %v469_v40 = vsel %vm411_vm1, %v467_v45, %v4697_v62  ;;  %v1142_v3 = vmul.f32 %v4852_v0, %v3303_v8  ;;  %v1908_v33 = vadd.f32 %v3461_v32, %v1872_v30  ;;  %v3975_v26 = vmul.f32 %v3531_v19, %v3303_v8 }
  0xfe   : > { %v1330_v49 = vadd.f32 %v1239_v24, %v1088_v52  ;;  %v546_v22 = vadd.f32 %v469_v40, %v303_v38  ;;  %v712_v25 = vsel %vm654_vm2, %v710_v2, %v4695_v57  ;;  %v1018_v10 = vrot.slane %v900_v50, 1 }
  0xff   : > { %v4693_v44 = vrot.slane %v3964_v29, 1  ;;  %v1260_v28 = vrot.slane %v1142_v3, 2  ;;  %2256 = vmatmul.msk.f32.gmra.mxu0 %vm1940_vm3, %v1908_v33  ;;  %v4854_v37 = vrot.slane %v4853_v34, 2  ;;  %v1450_v54 = vmul.f32 %v2343_v56, %v3317_v53 }
 0x100   : > { %v1396_v31 = vadd.f32 %v1364_v43, %v1330_v49  ;;  %v789_v48 = vadd.f32 %v712_v25, %v546_v22  ;;  %v4692_v47 = vrot.slane %v3975_v26, 2  ;;  %v3992_v43 = vmul.f32 %v3988_v11, %v3317_v53 }
 0x101   : > { %v1789_v61 = vsel %vm654_vm2, %v4854_v37, %v1788_v59  ;;  %v1020_v42 = vsel %vm411_vm1, %v1018_v10, %v4693_v44  ;;  %v1692_v27 = vmul.f32 %v2343_v56, %v3381_v5  ;;  %v1568_v24 = vrot.slane %v1450_v54, 1  ;;  %v276_v10 = vld [vmem:[%s2452_s10 + $0x198] sm:$0xff] }
 0x102   : > { %v1638_v21 = vadd.f32 %v1547_v13, %v1396_v31  ;;  %v855_v55 = vadd.f32 %v823_v6, %v789_v48  ;;  %v3997_v58 = vmul.f32 %v3988_v11, %v3381_v5  ;;  %v1262_v46 = vsel %vm654_vm2, %v1260_v28, %v4692_v47  ;;  %v2345_v13 = vld [vmem:[%s2452_s10 + $0x168] sm:$0xff]  ;;  %v4009_v6 = vld [vmem:[%s2452_s10 + $0x170] sm:$0xff]  ;;  %v4032_v28 = vld [vmem:[%s2452_s10 + $0x1a0] sm:$0xff] }
 0x103   : > { %v1373_v38 = vmul.f32 %v2343_v56, %v3332_v4  ;;  %v4687_v14 = vrot.slane %v3992_v43, 1  ;;  %v1810_v35 = vrot.slane %v1692_v27, 2  ;;  %v360_v45 = vmul.f32 %v2345_v13, %v3268_v15  ;;  %v4855_v31 = vld [vmem:[#allocation12_spill] sm:$0xff] }
 0x104   : > { %v1880_v12 = vadd.f32 %v1789_v61, %v1638_v21  ;;  %v1097_v1 = vadd.f32 %v1020_v42, %v855_v55  ;;  %v4686_v59 = vrot.slane %v3997_v58, 2  ;;  %v311_v0 = vmul.f32 %v2345_v13, %v3288_v17 }
 0x105   : > { %v4013_v30 = vmul.f32 %v4009_v6, %v3268_v15  ;;  %v603_v52 = vmul.f32 %v2345_v13, %v3275_v18  ;;  %v4018_v2 = vmul.f32 %v4009_v6, %v3275_v18  ;;  %v1570_v3 = vsel %vm411_vm1, %v1568_v24, %v4687_v14 }
 0x106   : > { %v1916_v40 = vadd.f32 %v3461_v32, %v1880_v12  ;;  %v1339_v50 = vadd.f32 %v1262_v46, %v1097_v1  ;;  %v487_v33 = vrot.slane %v360_v45, 1  ;;  %v1812_v49 = vsel %vm654_vm2, %v1810_v35, %v4686_v59 }
 0x107   : > { %v4691_v15 = vrot.slane %v4013_v30, 1  ;;  %v730_v22 = vrot.slane %v603_v52, 2  ;;  %v4688_v25 = vrot.slane %v4018_v2, 2  ;;  %v912_v34 = vmul.f32 %v3295_v23, %v4855_v31 }
 0x108   : > { %2264 = vmatmul.msk.f32.gmra.mxu1 %vm1940_vm3, %v1916_v40  ;;  %v1405_v18 = vadd.f32 %v1373_v38, %v1339_v50  ;;  %v4038_v37 = vmul.f32 %v3295_v23, %v3579_v41  ;;  %v1154_v61 = vmul.f32 %v3303_v8, %v4855_v31  ;;  %v831_v54 = vmul.f32 %v3310_v60, %v4855_v31 }
 0x109   : > { %v489_v48 = vsel %vm411_vm1, %v487_v33, %v4691_v15  ;;  %v732_v56 = vsel %vm654_vm2, %v730_v22, %v4688_v25  ;;  %v4052_v42 = vmul.f32 %v3303_v8, %v3579_v41  ;;  %v1038_v21 = vrot.slane %v912_v34, 1  ;;  %v2347_v33 = vld [vmem:[%s2452_s10 + $0x48] sm:$0xff]  ;;  %v4083_v22 = vld [vmem:[%s4542_s1 + $0x1] ss:$0 sm:$0xff] }
 0x10a   : > { %v1647_v23 = vadd.f32 %v1570_v3, %v1405_v18  ;;  %v554_v27 = vadd.f32 %v489_v48, %v311_v0  ;;  %v4685_v55 = vrot.slane %v4038_v37, 1  ;;  %v1280_v24 = vrot.slane %v1154_v61, 2 }
 0x10b   : > { %v4682_v46 = vrot.slane %v4052_v42, 2  ;;  %v1462_v38 = vmul.f32 %v3317_v53, %v276_v10  ;;  %v4059_v35 = vmul.f32 %v3317_v53, %v4032_v28  ;;  %v1381_v8 = vmul.f32 %v3332_v4, %v276_v10 }
 0x10c   : > { %v1889_v60 = vadd.f32 %v1812_v49, %v1647_v23  ;;  %v797_v12 = vadd.f32 %v732_v56, %v554_v27  ;;  %v1704_v1 = vmul.f32 %v3381_v5, %v276_v10  ;;  %v1040_v13 = vsel %vm411_vm1, %v1038_v21, %v4685_v55  ;;  %v4087_v10 = vld [vmem:[%s2452_s10 + $0x50] sm:$0xff]  ;;  %v4109_v27 = vld [vmem:[%s4542_s1 + $0x3] ss:$0 sm:$0xff]  ;;  %v4856_v21 = vld [vmem:[#allocation15_spill] sm:$0xff] }
 0x10d   : > { %v1588_v45 = vrot.slane %v1462_v38, 1  ;;  %v4680_v0 = vrot.slane %v4059_v35, 1  ;;  %v4069_v52 = vmul.f32 %v3381_v5, %v4032_v28  ;;  %v1282_v4 = vsel %vm654_vm2, %v1280_v24, %v4682_v46  ;;  %v4116_v38 = vld [vmem:[%s4542_s1 + $0x4] ss:$0 sm:$0xff]  ;;  %v4150_v46 = vld [vmem:[%s4542_s1 + $0x7] ss:$0 sm:$0xff] }
 0x10e   : > { %v1925_v53 = vadd.f32 %v3461_v32, %v1889_v60  ;;  %v863_v40 = vadd.f32 %v831_v54, %v797_v12  ;;  %v1830_v50 = vrot.slane %v1704_v1, 2  ;;  %v287_v49 = vmul.f32 %v2347_v33, %v3288_v17  ;;  %v4098_v17 = vld [vmem:[%s4542_s1 + $0x2] ss:$0 sm:$0xff] }
 0x10f   : > { %v1590_v3 = vsel %vm411_vm1, %v1588_v45, %v4680_v0  ;;  %v324_v18 = vmul.f32 %v4083_v22, %v2347_v33  ;;  %v4091_v31 = vmul.f32 %v4087_v10, %v4083_v22  ;;  %v4683_v61 = vrot.slane %v4069_v52, 2 }
 0x110   : > { %2273 = vmatmul.msk.f32.gmra.mxu2 %vm1940_vm3, %v1925_v53  ;;  %v1105_v34 = vadd.f32 %v1040_v13, %v863_v40  ;;  %v567_v48 = vmul.f32 %v4098_v17, %v2347_v33  ;;  %v4103_v56 = vmul.f32 %v4098_v17, %v4087_v10  ;;  %v807_v24 = vmul.f32 %v4109_v27, %v4856_v21  ;;  %v4131_v33 = vld [vmem:[%s4542_s1 + $0x5] ss:$0 sm:$0xff] }
 0x111   : > { %v427_v54 = vrot.slane %v324_v18, 1  ;;  %v4681_v23 = vrot.slane %v4091_v31, 1  ;;  %v876_v60 = vmul.f32 %v4116_v38, %v4856_v21  ;;  %v4123_v45 = vmul.f32 %v4116_v38, %v3680_v39 }
 0x112   : > { %v1347_v12 = vadd.f32 %v1282_v4, %v1105_v34  ;;  %v670_v1 = vrot.slane %v567_v48, 2  ;;  %v4684_v13 = vrot.slane %v4103_v56, 2  ;;  %v1118_v4 = vmul.f32 %v4131_v33, %v4856_v21 }
 0x113   : > { %v429_v53 = vsel %vm411_vm1, %v427_v54, %v4681_v23  ;;  %v978_v40 = vrot.slane %v876_v60, 1  ;;  %v4137_v18 = vmul.f32 %v4131_v33, %v3680_v39  ;;  %v4689_v60 = vrot.slane %v4123_v45, 1 }
 0x114   : > { %v1413_v34 = vadd.f32 %v1381_v8, %v1347_v12  ;;  %v530_v48 = vadd.f32 %v429_v53, %v287_v49  ;;  %v672_v54 = vsel %vm654_vm2, %v670_v1, %v4684_v13  ;;  %v1832_v0 = vsel %vm654_vm2, %v1830_v50, %v4683_v61  ;;  %v2355_v8 = vld [vmem:[%s2452_s10 + $0x78] sm:$0xff]  ;;  %v4157_v53 = vld [vmem:[%s4542_s1 + $0x6] ss:$0 sm:$0xff] }
 0x115   : > { %v1220_v23 = vrot.slane %v1118_v4, 2  ;;  %v4690_v21 = vrot.slane %v4137_v18, 2  ;;  %v1426_v49 = vmul.f32 %v2355_v8, %v4150_v46  ;;  %v1357_v50 = vmul.f32 %v4157_v53, %v2355_v8  ;;  %v4161_v4 = vld [vmem:[%s2452_s10 + $0x80] sm:$0xff] }
 0x116   : > { %v1655_v12 = vadd.f32 %v1590_v3, %v1413_v34  ;;  %v773_v1 = vadd.f32 %v672_v54, %v530_v48  ;;  %v4165_v61 = vmul.f32 %v4161_v4, %v4150_v46  ;;  %v980_v3 = vsel %vm411_vm1, %v978_v40, %v4689_v60  ;;  %v4182_v40 = vld [vmem:[%s4542_s1] ss:$0 sm:$0xff]  ;;  %v4188_v60 = vld [vmem:[%s2452_s10 + $0xb0] sm:$0xff] }
 0x117   : > { %v1528_v34 = vrot.slane %v1426_v49, 1  ;;  %v1668_v48 = vmul.f32 %v2355_v8, %v3381_v5  ;;  %v4173_v54 = vmul.f32 %v4161_v4, %v3381_v5  ;;  %v1222_v59 = vsel %vm654_vm2, %v1220_v23, %v4690_v21  ;;  %v2359_v49 = vld [vmem:[%s2452_s10 + $0xa8] sm:$0xff] }
 0x118   : > { %4857 = vst [vmem:[#allocation8_spill] sm:$0xff] %v4165_v61  ;;  %v1897_v13 = vadd.f32 %v1832_v0, %v1655_v12  ;;  %v839_v55 = vadd.f32 %v807_v24, %v773_v1  ;;  %v4694_v14 = vrot.slane %v4165_v61, 1  ;;  %v295_v8 = vmul.f32 %v2359_v49, %v4182_v40 }
 0x119   : > { %4858 = vst [vmem:[#allocation11_spill] sm:$0xff] %v4173_v54  ;;  %v1770_v25 = vrot.slane %v1668_v48, 2  ;;  %v336_v5 = vmul.f32 %v2359_v49, %v4083_v22  ;;  %v4192_v0 = vmul.f32 %v4188_v60, %v4083_v22  ;;  %v4701_v12 = vrot.slane %v4173_v54, 2  ;;  %v2364_v54 = vld [vmem:[%s2452_s10 + $0x118] sm:$0x3] }
 0x11a   : > { %v1933_v23 = vadd.f32 %v3461_v32, %v1897_v13  ;;  %v1081_v24 = vadd.f32 %v980_v3, %v839_v55  ;;  %v579_v1 = vmul.f32 %v2359_v49, %v4098_v17  ;;  %v1530_v48 = vsel %vm411_vm1, %v1528_v34, %v4694_v14  ;;  %v4860_v55 = vld [vmem:[#allocation14_spill] sm:$0xff] }
 0x11b   : > { %4859 = vst [vmem:[#allocation13_spill] sm:$0xff] %v4192_v0  ;;  %v447_v21 = vrot.slane %v336_v5, 1  ;;  %v4696_v15 = vrot.slane %v4192_v0, 1  ;;  %v4203_v47 = vmul.f32 %v4188_v60, %v4098_v17  ;;  %v815_v3 = vmul.f32 %v4109_v27, %v4860_v55 }
 0x11c   : > { %2281 = vmatmul.msk.f32.gmra.mxu3 %vm1940_vm3, %v1933_v23  ;;  %v1323_v44 = vadd.f32 %v1222_v59, %v1081_v24  ;;  %v690_v13 = vrot.slane %v579_v1, 2  ;;  %v888_v49 = vmul.f32 %v4116_v38, %v4860_v55  ;;  %v4216_v14 = vmul.f32 %v4116_v38, %v4847_v36 }
 0x11d   : > { %v449_v34 = vsel %vm411_vm1, %v447_v21, %v4696_v15  ;;  %v4702_v5 = vrot.slane %v4203_v47, 2  ;;  %v1130_v59 = vmul.f32 %v4131_v33, %v4860_v55  ;;  %v4222_v57 = vmul.f32 %v4131_v33, %v4847_v36 }
 0x11e   : > { %4861 = vst [vmem:[#allocation6_spill] sm:$0xff] %v4216_v14  ;;  %v1389_v23 = vadd.f32 %v1357_v50, %v1323_v44  ;;  %v538_v24 = vadd.f32 %v449_v34, %v295_v8  ;;  %v998_v1 = vrot.slane %v888_v49, 1  ;;  %v1772_v21 = vsel %vm654_vm2, %v1770_v25, %v4701_v12  ;;  %v2361_v50 = vld [vmem:[%s2452_s10 + $0xd8] sm:$0xff]  ;;  %v4238_v25 = vld [vmem:[%s2452_s10 + $0xe0] sm:$0xff] }
 0x11f   : > { %v692_v15 = vsel %vm654_vm2, %v690_v13, %v4702_v5  ;;  %v4700_v62 = vrot.slane %v4216_v14, 1  ;;  %v1240_v61 = vrot.slane %v1130_v59, 2  ;;  %v4707_v44 = vrot.slane %v4222_v57, 2  ;;  %4862 = vst [vmem:[#allocation16_spill] sm:$0xff] %v4238_v25 }
 0x120   : > { %v1631_v0 = vadd.f32 %v1530_v48, %v1389_v23  ;;  %v781_v55 = vadd.f32 %v692_v15, %v538_v24  ;;  %v1438_v8 = vmul.f32 %v2361_v50, %v4150_v46  ;;  %v4242_v13 = vmul.f32 %v4238_v25, %v4150_v46  ;;  %v4247_v15 = vld [vmem:[%s4542_s1 + $0x8] ss:$0 sm:$0xff] }
 0x121   : > { %v1000_v49 = vsel %vm411_vm1, %v998_v1, %v4700_v62  ;;  %v1680_v48 = vmul.f32 %v4247_v15, %v2361_v50  ;;  %v4252_v34 = vmul.f32 %v4247_v15, %v4238_v25  ;;  %v1242_v24 = vsel %vm654_vm2, %v1240_v61, %v4707_v44 }
 0x122   : > { %v1873_v59 = vadd.f32 %v1772_v21, %v1631_v0  ;;  %v847_v23 = vadd.f32 %v815_v3, %v781_v55  ;;  %v1365_v1 = vmul.f32 %v2361_v50, %v4157_v53  ;;  %v1548_v62 = vrot.slane %v1438_v8, 1  ;;  %v4863_v21 = vld [vmem:[#allocation5_spill] sm:$0xff] }
 0x123   : > { %v1549_v12 = vrot.slane %v4242_v13, 1  ;;  %v350_v36 = vmul.f32 %v2364_v54, %v4083_v22  ;;  %v593_v25 = vmul.f32 %v2364_v54, %v4098_v17  ;;  %v1790_v0 = vrot.slane %v1680_v48, 2 }
 0x124   : > { %v1909_v5 = vadd.f32 %v3461_v32, %v1873_v59  ;;  %v1089_v14 = vadd.f32 %v1000_v49, %v847_v23  ;;  %v1791_v3 = vrot.slane %v4252_v34, 2  ;;  %v304_v61 = vmul.f32 %v4182_v40, %v3942_v51  ;;  %v2365_v59 = vld [vmem:[%s2452_s10 + $0x148] sm:$0x3] }
 0x125   : > { %v902_v55 = vmul.f32 %v4116_v38, %v4863_v21  ;;  %v470_v32 = vrot.slane %v350_v36, 1  ;;  %v713_v8 = vrot.slane %v593_v25, 2  ;;  %v1144_v49 = vmul.f32 %v4131_v33, %v4863_v21 }
 0x126   : > { %2257 = vmatmul.msk.f32.gmra.mxu0 %vm1940_vm3, %v1909_v5  ;;  %v1331_v50 = vadd.f32 %v1242_v24, %v1089_v14  ;;  %v1550_v54 = vsel %vm411_vm1, %v1548_v62, %v1549_v12  ;;  %v1452_v51 = vmul.f32 %v2365_v59, %v4150_v46  ;;  %v4864_v44 = vrot.slane %v3946_v7, 1 }
 0x127   : > { %v1021_v48 = vrot.slane %v902_v55, 1  ;;  %v4865_v36 = vrot.slane %v3951_v16, 2  ;;  %v1694_v25 = vmul.f32 %v2365_v59, %v4247_v15  ;;  %v1792_v62 = vsel %vm654_vm2, %v1790_v0, %v1791_v3 }
 0x128   : > { %v1397_v23 = vadd.f32 %v1365_v1, %v1331_v50  ;;  %v471_v14 = vsel %vm411_vm1, %v4864_v44, %v470_v32  ;;  %v824_v21 = vmul.f32 %v4109_v27, %v3531_v19  ;;  %v1263_v55 = vrot.slane %v1144_v49, 2  ;;  %v2366_v50 = vld [vmem:[%s2452_s10 + $0x178] sm:$0x3] }
 0x129   : > { %v714_v5 = vsel %vm654_vm2, %v4865_v36, %v713_v8  ;;  %v547_v24 = vadd.f32 %v471_v14, %v304_v61  ;;  %v4866_v7 = vrot.slane %v3964_v29, 1  ;;  %v1374_v16 = vmul.f32 %v4157_v53, %v3988_v11  ;;  %v278_v36 = vld [vmem:[%s2452_s10 + $0x1a8] sm:$0x3] }
 0x12a   : > { %v1639_v1 = vadd.f32 %v1550_v54, %v1397_v23  ;;  %v362_v32 = vmul.f32 %v2366_v50, %v4083_v22  ;;  %v1571_v59 = vrot.slane %v1452_v51, 1  ;;  %v312_v0 = vmul.f32 %v4182_v40, %v4009_v6  ;;  %v4309_v6 = vld [vmem:[%s4543_s2] ss:$0 sm:$0xff] }
 0x12b   : > { %v1022_v44 = vsel %vm411_vm1, %v4866_v7, %v1021_v48  ;;  %v790_v8 = vadd.f32 %v714_v5, %v547_v24  ;;  %v605_v19 = vmul.f32 %v2366_v50, %v4098_v17  ;;  %v1813_v49 = vrot.slane %v1694_v25, 2 }
 0x12c   : > { %v1881_v61 = vadd.f32 %v1792_v62, %v1639_v1  ;;  %v490_v54 = vrot.slane %v362_v32, 1  ;;  %v914_v29 = vmul.f32 %v4116_v38, %v3821_v63  ;;  %v4867_v11 = vrot.slane %v3975_v26, 2 }
 0x12d   : > { %v856_v48 = vadd.f32 %v824_v21, %v790_v8  ;;  %v733_v14 = vrot.slane %v605_v19, 2  ;;  %v1156_v51 = vmul.f32 %v4131_v33, %v3821_v63  ;;  %v4868_v25 = vrot.slane %v4013_v30, 1 }
 0x12e   : > { %v1264_v23 = vsel %vm654_vm2, %v4867_v11, %v1263_v55  ;;  %v1917_v5 = vadd.f32 %v4309_v6, %v1881_v61  ;;  %v1041_v24 = vrot.slane %v914_v29, 1  ;;  %v1464_v26 = vmul.f32 %v4150_v46, %v278_v36  ;;  %v2368_v29 = vld [vmem:[%s2452_s10 + $0x58] sm:$0x3] }
 0x12f   : > { %v491_v62 = vsel %vm411_vm1, %v4868_v25, %v490_v54  ;;  %v1098_v21 = vadd.f32 %v1022_v44, %v856_v48  ;;  %v4869_v1 = vrot.slane %v4018_v2, 2  ;;  %v832_v7 = vmul.f32 %v4109_v27, %v3579_v41  ;;  %v4331_v2 = vpop.f32.mrf.mxu1 }
 0x130   : > { %v555_v55 = vadd.f32 %v491_v62, %v312_v0  ;;  %2265 = vmatmul.msk.f32.gmra.mxu1 %vm1940_vm3, %v1917_v5  ;;  %v4870_v50 = vrot.slane %v3992_v43, 1  ;;  %v4871_v32 = vrot.slane %v3997_v58, 2  ;;  %v1283_v19 = vrot.slane %v1156_v51, 2  ;;  %v4329_v0 = vpop.f32.mrf.mxu0  ;;  %v4339_v58 = vpop.f32.mrf.mxu3 }
 0x131   : > { %v734_v63 = vsel %vm654_vm2, %v4869_v1, %v733_v14  ;;  %v1706_v44 = vmul.f32 %v4247_v15, %v278_v36  ;;  %v1340_v61 = vadd.f32 %v1264_v23, %v1098_v21  ;;  %v1382_v41 = vmul.f32 %v4157_v53, %v4032_v28 }
 0x132   : > { %v1572_v30 = vsel %vm411_vm1, %v4870_v50, %v1571_v59  ;;  %v1814_v8 = vsel %vm654_vm2, %v4871_v32, %v1813_v49  ;;  %v798_v54 = vadd.f32 %v734_v63, %v555_v55  ;;  %v326_v43 = vmul.f32 %v2368_v29, %v4083_v22  ;;  %v4337_v59 = vpop.f32.mrf.mxu2 }
 0x133   : > { %v4872_v49 = vrot.slane %v4038_v37, 1  ;;  %v1591_v48 = vrot.slane %v1464_v26, 1  ;;  %v288_v11 = vmul.f32 %v4182_v40, %v4087_v10  ;;  %v569_v23 = vmul.f32 %v2368_v29, %v4098_v17 }
 0x134   : > { %v1406_v14 = vadd.f32 %v1374_v16, %v1340_v61  ;;  %v864_v51 = vadd.f32 %v832_v7, %v798_v54  ;;  %v430_v28 = vrot.slane %v326_v43, 1  ;;  %v878_v5 = vmul.f32 %v4116_v38, %v3879_v20 }
 0x135   : > { %v1042_v36 = vsel %vm411_vm1, %v4872_v49, %v1041_v24  ;;  %v4873_v25 = vrot.slane %v4052_v42, 2  ;;  %v1833_v37 = vrot.slane %v1706_v44, 2  ;;  %v673_v21 = vrot.slane %v569_v23, 2  ;;  %v2370_v23 = vld [vmem:[%s2452_s10 + $0xb8] sm:$0x3] }
 0x136   : > { %v1120_v24 = vmul.f32 %v4131_v33, %v3879_v20  ;;  %v1648_v26 = vadd.f32 %v1572_v30, %v1406_v14  ;;  %v1106_v10 = vadd.f32 %v1042_v36, %v864_v51  ;;  %v4874_v55 = vrot.slane %v4091_v31, 1  ;;  %v2369_v31 = vld [vmem:[%s2452_s10 + $0x88] sm:$0x3] }
 0x137   : > { %v1284_v62 = vsel %vm654_vm2, %v4873_v25, %v1283_v19  ;;  %v981_v1 = vrot.slane %v878_v5, 1  ;;  %v4875_v7 = vrot.slane %v4103_v56, 2  ;;  %v808_v50 = vmul.f32 %v4109_v27, %v3680_v39 }
 0x138   : > { %v431_v16 = vsel %vm411_vm1, %v4874_v55, %v430_v28  ;;  %v1223_v32 = vrot.slane %v1120_v24, 2  ;;  %v1890_v19 = vadd.f32 %v1814_v8, %v1648_v26  ;;  %v1348_v44 = vadd.f32 %v1284_v62, %v1106_v10  ;;  %v2061_v49 = vpop.f32.mrf.mxu0  ;;  %v2085_v8 = vpop.f32.mrf.mxu1 }
 0x139   : > { %v531_v63 = vadd.f32 %v431_v16, %v288_v11  ;;  %v674_v42 = vsel %vm654_vm2, %v4875_v7, %v673_v21  ;;  %v4876_v20 = vrot.slane %v4059_v35, 1  ;;  %v1428_v61 = vmul.f32 %v2369_v31, %v4150_v46  ;;  %v2133_v51 = vpop.f32.mrf.mxu3 }
 0x13a   : > { %v4877_v54 = vrot.slane %v4069_v52, 2  ;;  %v1358_v43 = vmul.f32 %v4161_v4, %v4157_v53  ;;  %v1670_v39 = vmul.f32 %v2369_v31, %v4247_v15  ;;  %v1926_v36 = vadd.f32 %v4309_v6, %v1890_v19  ;;  %v2109_v14 = vpop.f32.mrf.mxu2  ;;  %v4886_v31 = vld [vmem:[#allocation11_spill] sm:$0xff] }
 0x13b   : > { %v1592_v30 = vsel %vm411_vm1, %v4876_v20, %v1591_v48  ;;  %v774_v29 = vadd.f32 %v674_v42, %v531_v63  ;;  %v1414_v35 = vadd.f32 %v1382_v41, %v1348_v44  ;;  %v4878_v48 = vrot.slane %v4123_v45, 1  ;;  %v4883_v42 = vld [vmem:[#allocation4_spill] sm:$0xff]  ;;  %v2371_v20 = vld [vmem:[%s2452_s10 + $0xe8] sm:$0x3] }
 0x13c   : > { %v1834_v56 = vsel %vm654_vm2, %v4877_v54, %v1833_v37  ;;  %v338_v52 = vmul.f32 %v2370_v23, %v4083_v22  ;;  %v4879_v4 = vrot.slane %v4137_v18, 2  ;;  %v296_v25 = vmul.f32 %v4188_v60, %v4182_v40  ;;  %2274 = vmatmul.msk.f32.gmra.mxu2 %vm1940_vm3, %v1926_v36  ;;  %v4880_v40 = vld [vmem:[#allocation13_spill] sm:$0xff] }
 0x13d   : > { %v982_v11 = vsel %vm411_vm1, %v4878_v48, %v981_v1  ;;  %v840_v28 = vadd.f32 %v808_v50, %v774_v29  ;;  %v581_v41 = vmul.f32 %v2370_v23, %v4098_v17  ;;  %v1656_v45 = vadd.f32 %v1592_v30, %v1414_v35  ;;  %v4394_v17 = vld [vmem:[%s4545_s4] ss:$0 sm:$0xff]  ;;  %v4884_v50 = vld [vmem:[#allocation8_spill] sm:$0xff] }
 0x13e   : > { %v1224_v5 = vsel %vm654_vm2, %v4879_v4, %v1223_v32  ;;  %v1531_v62 = vrot.slane %v1428_v61, 1  ;;  %v450_v37 = vrot.slane %v338_v52, 1  ;;  %v890_v22 = vmul.f32 %v4116_v38, %v3916_v9 }
 0x13f   : > { %v1082_v21 = vadd.f32 %v982_v11, %v840_v28  ;;  %v1773_v24 = vrot.slane %v1670_v39, 2  ;;  %v693_v26 = vrot.slane %v581_v41, 2  ;;  %v1132_v18 = vmul.f32 %v4131_v33, %v3916_v9 }
 0x140   : > { %v1898_v60 = vadd.f32 %v1834_v56, %v1656_v45  ;;  %v4881_v10 = vrot.slane %v4880_v40, 1  ;;  %v1001_v16 = vrot.slane %v890_v22, 1  ;;  %v4882_v63 = vrot.slane %v4203_v47, 2  ;;  %v2064_v29 = vpop.f32.mrf.mxu0  ;;  %v2088_v39 = vpop.f32.mrf.mxu1 }
 0x141   : > { %v1324_v38 = vadd.f32 %v1224_v5, %v1082_v21  ;;  %v816_v9 = vmul.f32 %v4109_v27, %v4883_v42  ;;  %v4885_v32 = vrot.slane %v4884_v50, 1  ;;  %v1243_v44 = vrot.slane %v1132_v18, 2  ;;  %v2136_v23 = vpop.f32.mrf.mxu3 }
 0x142   : > { %v451_v55 = vsel %vm411_vm1, %v4881_v10, %v450_v37  ;;  %v694_v7 = vsel %vm654_vm2, %v4882_v63, %v693_v26  ;;  %v1934_v33 = vadd.f32 %v4309_v6, %v1898_v60  ;;  %v1440_v30 = vmul.f32 %v2371_v20, %v4150_v46  ;;  %v4888_v46 = vld [vmem:[#allocation6_spill] sm:$0xff]  ;;  %v2112_v11 = vpop.f32.mrf.mxu2 }
 0x143   : > { %v539_v1 = vadd.f32 %v451_v55, %v296_v25  ;;  %v1532_v19 = vsel %vm411_vm1, %v4885_v32, %v1531_v62  ;;  %v1390_v47 = vadd.f32 %v1358_v43, %v1324_v38  ;;  %v4887_v61 = vrot.slane %v4886_v31, 2 }
 0x144   : > { %v2059_v56 = vadd.f32 %v4394_v17, %v4329_v0  ;;  %2282 = vmatmul.msk.f32.gmra.mxu3 %vm1940_vm3, %v1934_v33  ;;  %v4889_v36 = vrot.slane %v4888_v46, 1  ;;  %v1682_v48 = vmul.f32 %v2371_v20, %v4247_v15  ;;  %v2083_v43 = vadd.f32 %v4394_v17, %v4331_v2 }
 0x145   : > { %v1774_v27 = vsel %vm654_vm2, %v4887_v61, %v1773_v24  ;;  %v782_v54 = vadd.f32 %v694_v7, %v539_v1  ;;  %v1632_v52 = vadd.f32 %v1532_v19, %v1390_v47  ;;  %v2107_v28 = vadd.f32 %v4394_v17, %v4337_v59  ;;  %v4891_v59 = vld [vmem:[#allocation16_spill] sm:$0xff] }
 0x146   : > { %v1002_v35 = vsel %vm411_vm1, %v4889_v36, %v1001_v16  ;;  %2155 = vst.msk [vmem:[%s4413_s23] sm:$0xff] %vm2154_vm4, %v2059_v56  ;;  %v2131_v4 = vadd.f32 %v4394_v17, %v4339_v58  ;;  %v4890_v15 = vrot.slane %v4222_v57, 2  ;;  %v1551_v2 = vrot.slane %v1440_v30, 1 }
 0x147   : > { %v848_v0 = vadd.f32 %v816_v9, %v782_v54  ;;  %2163 = vst.msk [vmem:[%s4413_s23 + $0x40] sm:$0xff] %vm2154_vm4, %v2083_v43  ;;  %v2062_v25 = vadd.f32 %v4394_v17, %v2061_v49  ;;  %v2086_v41 = vadd.f32 %v4394_v17, %v2085_v8  ;;  %v1874_v45 = vadd.f32 %v1774_v27, %v1632_v52 }
 0x148   : > { %v1244_v5 = vsel %vm654_vm2, %v4890_v15, %v1243_v44  ;;  %v1366_v37 = vmul.f32 %v4891_v59, %v4157_v53  ;;  %2171 = vst.msk [vmem:[%s4413_s23 + $0x80] sm:$0xff] %vm2154_vm4, %v2107_v28  ;;  %v2110_v57 = vadd.f32 %v4394_v17, %v2109_v14  ;;  %v1793_v58 = vrot.slane %v1682_v48, 2  ;;  %v2067_v26 = vpop.f32.mrf.mxu0  ;;  %v2091_v18 = vpop.f32.mrf.mxu1 }
 0x149   : > { %v1090_v62 = vadd.f32 %v1002_v35, %v848_v0  ;;  %2179 = vst.msk [vmem:[%s4413_s23 + $0xc0] sm:$0xff] %vm2154_vm4, %v2131_v4  ;;  %v2134_v22 = vadd.f32 %v4394_v17, %v2133_v51  ;;  %v1910_v49 = vadd.f32 %v4309_v6, %v1874_v45  ;;  %v2065_v8 = vadd.f32 %v4394_v17, %v2064_v29  ;;  %v2139_v55 = vpop.f32.mrf.mxu3 }
 0x14a   : > { %2156 = vst.msk [vmem:[%s4413_s23 + $0x8] sm:$0xff] %vm2154_vm4, %v2062_v25  ;;  %v1552_v53 = vsel %vm411_vm1, %v1549_v12, %v1551_v2  ;;  %v2089_v14 = vadd.f32 %v4394_v17, %v2088_v39  ;;  %v2113_v24 = vadd.f32 %v4394_v17, %v2112_v11  ;;  %v1794_v12 = vsel %vm654_vm2, %v1791_v3, %v1793_v58  ;;  %v2115_v60 = vpop.f32.mrf.mxu2 }
 0x14b   : > { %v1332_v21 = vadd.f32 %v1244_v5, %v1090_v62  ;;  %2164 = vst.msk [vmem:[%s4413_s23 + $0x48] sm:$0xff] %vm2154_vm4, %v2086_v41  ;;  %2258 = vmatmul.msk.f32.gmra.mxu0 %vm1940_vm3, %v1910_v49  ;;  %v2137_v13 = vadd.f32 %v4394_v17, %v2136_v23  ;;  %v2068_v10 = vadd.f32 %v4394_v17, %v2067_v26 }
 0x14c   : > { %2172 = vst.msk [vmem:[%s4413_s23 + $0x88] sm:$0xff] %vm2154_vm4, %v2110_v57  ;;  %v2092_v34 = vadd.f32 %v4394_v17, %v2091_v18  ;;  %v2116_v16 = vadd.f32 %v4394_v17, %v2115_v60  ;;  %v2140_v38 = vadd.f32 %v4394_v17, %v2139_v55 }
 0x14d   : > { %v1398_v51 = vadd.f32 %v1366_v37, %v1332_v21  ;;  %2180 = vst.msk [vmem:[%s4413_s23 + $0xc8] sm:$0xff] %vm2154_vm4, %v2134_v22 }
 0x14e   : > { %2157 = vst.msk [vmem:[%s4413_s23 + $0x10] sm:$0xff] %vm2154_vm4, %v2065_v8 }
 0x14f   : > { %v1640_v40 = vadd.f32 %v1552_v53, %v1398_v51  ;;  %2165 = vst.msk [vmem:[%s4413_s23 + $0x50] sm:$0xff] %vm2154_vm4, %v2089_v14 }
 0x150   : > { %2173 = vst.msk [vmem:[%s4413_s23 + $0x90] sm:$0xff] %vm2154_vm4, %v2113_v24 }
 0x151   : > { %v1882_v3 = vadd.f32 %v1794_v12, %v1640_v40  ;;  %2181 = vst.msk [vmem:[%s4413_s23 + $0xd0] sm:$0xff] %vm2154_vm4, %v2137_v13  ;;  %v2142_v42 = vpop.f32.mrf.mxu3 }
 0x152   : > { %2158 = vst.msk [vmem:[%s4413_s23 + $0x18] sm:$0xff] %vm2154_vm4, %v2068_v10  ;;  %v2118_v63 = vpop.f32.mrf.mxu2 }
 0x153   : > { %v1918_v1 = vadd.f32 %v4309_v6, %v1882_v3  ;;  %2166 = vst.msk [vmem:[%s4413_s23 + $0x58] sm:$0xff] %vm2154_vm4, %v2092_v34  ;;  %v2119_v7 = vadd.f32 %v4394_v17, %v2118_v63  ;;  %v2143_v6 = vadd.f32 %v4394_v17, %v2142_v42 }
 0x154   : > { %2174 = vst.msk [vmem:[%s4413_s23 + $0x98] sm:$0xff] %vm2154_vm4, %v2116_v16 }
 0x155   : > { %2266 = vmatmul.msk.f32.gmra.mxu1 %vm1940_vm3, %v1918_v1  ;;  %2182 = vst.msk [vmem:[%s4413_s23 + $0xd8] sm:$0xff] %vm2154_vm4, %v2140_v38  ;;  %v2070_v9 = vpop.f32.mrf.mxu0 }
 0x156   : > { %2175 = vst.msk [vmem:[%s4413_s23 + $0xa0] sm:$0xff] %vm2154_vm4, %v2119_v7  ;;  %v2071_v33 = vadd.f32 %v4394_v17, %v2070_v9 }
 0x157   : > { %2183 = vst.msk [vmem:[%s4413_s23 + $0xe0] sm:$0xff] %vm2154_vm4, %v2143_v6 }
 0x158   : > { %2159 = vst.msk [vmem:[%s4413_s23 + $0x20] sm:$0xff] %vm2154_vm4, %v2071_v33 }
 0x160   : > { %v2094_v50 = vpop.f32.mrf.mxu1 }
 0x161   : > { %v2095_v32 = vadd.f32 %v4394_v17, %v2094_v50 }
 0x163   : > { %2167 = vst.msk [vmem:[%s4413_s23 + $0x60] sm:$0xff] %vm2154_vm4, %v2095_v32 }
 0x173   : > { %v2121_v19 = vpop.f32.mrf.mxu2 }
 0x174   : > { %v2122_v44 = vadd.f32 %v4394_v17, %v2121_v19 }
 0x176   : > { %2176 = vst.msk [vmem:[%s4413_s23 + $0xa8] sm:$0xff] %vm2154_vm4, %v2122_v44 }
 0x17a   : > { %v2145_v20 = vpop.f32.mrf.mxu3 }
 0x17b   : > { %v2146_v47 = vadd.f32 %v4394_v17, %v2145_v20 }
 0x17c   : > { %v2073_v30 = vpop.f32.mrf.mxu0 }
 0x17d   : > { %v2074_v31 = vadd.f32 %v4394_v17, %v2073_v30  ;;  %2184 = vst.msk [vmem:[%s4413_s23 + $0xe8] sm:$0xff] %vm2154_vm4, %v2146_v47 }
 0x17f   : > { %2160 = vst.msk [vmem:[%s4413_s23 + $0x28] sm:$0xff] %vm2154_vm4, %v2074_v31 }
 0x185   : > { %v2097_v61 = vpop.f32.mrf.mxu1 }
 0x186   : > { %v2098_v27 = vadd.f32 %v4394_v17, %v2097_v61 }
 0x188   : > { %2168 = vst.msk [vmem:[%s4413_s23 + $0x68] sm:$0xff] %vm2154_vm4, %v2098_v27 }
 0x193   : > { %v2124_v54 = vpop.f32.mrf.mxu2 }
 0x194   : > { %v2125_v56 = vadd.f32 %v4394_v17, %v2124_v54 }
 0x196   : > { %2177 = vst.msk [vmem:[%s4413_s23 + $0xb0] sm:$0xff] %vm2154_vm4, %v2125_v56 }
 0x19f   : > { %v2148_v29 = vpop.f32.mrf.mxu3 }
 0x1a0   : > { %v2149_v39 = vadd.f32 %v4394_v17, %v2148_v29 }
 0x1a2   : > { %2185 = vst.msk [vmem:[%s4413_s23 + $0xf0] sm:$0xff] %vm2154_vm4, %v2149_v39 }
 0x1a3   : > { %v2076_v46 = vpop.f32.mrf.mxu0 }
 0x1a4   : > { %v2077_v36 = vadd.f32 %v4394_v17, %v2076_v46 }
 0x1a6   : > { %2161 = vst.msk [vmem:[%s4413_s23 + $0x30] sm:$0xff] %vm2154_vm4, %v2077_v36 }
 0x1ad   : > { %v2100_v35 = vpop.f32.mrf.mxu1 }
 0x1ae   : > { %v2101_v48 = vadd.f32 %v4394_v17, %v2100_v35 }
 0x1b0   : > { %2169 = vst.msk [vmem:[%s4413_s23 + $0x70] sm:$0xff] %vm2154_vm4, %v2101_v48 }
 0x1bf   : > { %v2127_v43 = vpop.f32.mrf.mxu2 }
 0x1c0   : > { %v2128_v11 = vadd.f32 %v4394_v17, %v2127_v43 }
 0x1c2   : > { %2178 = vst.msk [vmem:[%s4413_s23 + $0xb8] sm:$0xff] %vm2154_vm4, %v2128_v11 }
 0x1c7   : > { %v2151_v23 = vpop.f32.mrf.mxu3 }
 0x1c8   : > { %v2079_v52 = vpop.f32.mrf.mxu0  ;;  %v2152_v0 = vadd.f32 %v4394_v17, %v2151_v23 }
 0x1c9   : > { %v2080_v28 = vadd.f32 %v4394_v17, %v2079_v52 }
 0x1ca   : > { %2186 = vst.msk [vmem:[%s4413_s23 + $0xf8] sm:$0xff] %vm2154_vm4, %v2152_v0 }
 0x1cb   : > { %2162 = vst.msk [vmem:[%s4413_s23 + $0x38] sm:$0xff] %vm2154_vm4, %v2080_v28 }
 0x1d2   : > { %v2103_v4 = vpop.f32.mrf.mxu1 }
 0x1d3   : > { %v2104_v15 = vadd.f32 %v4394_v17, %v2103_v4 }
 0x1d5   : > { %2170 = vst.msk [vmem:[%s4413_s23 + $0x78] sm:$0xff] %vm2154_vm4, %v2104_v15 }
 0x1d6 PF: > { %s15_s18 = sadd.s32 1, %s2378_s18  }
 0x1d7   : > { %p12_p4 = scmp.ge.s32.totalorder %s15_s18, 4  }
 0x1d9   :  { %14 = sbr.rel (!%p12_p4) target bundleno = 1 (0x1), region = 70 }

</bundles_post_ra>
